<compile_context>
chip_gen: v6e
topology: v6e:2x2x1
jax: 0.10.0
libtpu: 0.0.40
codegen_flags: <defaults>
</compile_context>

<pallas_src>
import jax
import jax.numpy as jnp
from jax.experimental import pallas as pl
from jax.experimental.pallas import tpu as pltpu

# The original script reads mydatas/breast_cancer.csv; features = n_cols - 1 = 9.
# Everything below (offsets, specs) is derived from FEATURES.
FEATURES = 9
H1, H2, OUT = 6, 4, 1

# Flat SMEM parameter layout (offsets in f32 words). Total 93 words -> 512 B SMEM.
W1_OFF = 0
B1_OFF = W1_OFF + H1 * FEATURES        # 54
W2_OFF = B1_OFF + H1                   # 60
B2_OFF = W2_OFF + H2 * H1              # 84
W3_OFF = B2_OFF + H2                   # 88
B3_OFF = W3_OFF + OUT * H2             # 92
P_LEN = B3_OFF + OUT                   # 93

_LANE = 128
_MAX_TBL = 1024   # lanes per feature plane -> up to 8*1024 = 8192 samples / step


def _sigmoid(z):
    # sigmoid(z) = 0.5 * tanh(0.5 z) + 0.5  (tanh -> EUP, rest -> cheap VALU).
    return 0.5 * jnp.tanh(0.5 * z) + 0.5


def _neuron(p_ref, w_off, b_off, n_in, load_in):
    # acc = b_j + sum_k w_jk * x_k ; every operand a full (8, TBL) vreg slab,
    # every weight/bias a scalar splat read from SMEM (static offsets).
    acc = load_in(0) * p_ref[w_off] + p_ref[b_off]
    for k in range(1, n_in):
        acc = acc + load_in(k) * p_ref[w_off + k]
    return _sigmoid(acc)


def mlp_kernel(x_ref, p_ref, o_ref):
    # x_ref: (F, 8, TBL) feature planes, batch spread over sublanes AND lanes.
    # p_ref: (P_LEN,) f32 in SMEM.   o_ref: (8, TBL) lane-dense output plane.
    h1 = [_neuron(p_ref, W1_OFF + j * FEATURES, B1_OFF + j, FEATURES,
                  lambda k: x_ref[k]) for j in range(H1)]
    h2 = [_neuron(p_ref, W2_OFF + j * H1, B2_OFF + j, H1,
                  lambda k: h1[k]) for j in range(H2)]
    y = _neuron(p_ref, W3_OFF, B3_OFF, H2, lambda k: h2[k])
    o_ref[...] = y


def pack_params(w1, b1, w2, b2, w3, b3):
    """Flatten torch-oriented params (w:(out,in), b:(out,)) into one f32 vector."""
    return jnp.concatenate([
        jnp.asarray(w1, jnp.float32).reshape(-1),
        jnp.asarray(b1, jnp.float32).reshape(-1),
        jnp.asarray(w2, jnp.float32).reshape(-1),
        jnp.asarray(b2, jnp.float32).reshape(-1),
        jnp.asarray(w3, jnp.float32).reshape(-1),
        jnp.asarray(b3, jnp.float32).reshape(-1),
    ])


def _choose_tile(batch):
    """Pick lanes-per-plane (tbl) and grid size: big tiles (few grid steps, big
    DMAs), but >= 2 tiles for large batches so the batch axis can shard across
    both TensorCores on v7x.  On v5e/v6e (1 TC) the same choice just means few,
    large tiles."""
    if batch <= 8 * _LANE:                                 # <= 1024 samples
        return _LANE, 1
    two_tile = -(-batch // (2 * 8 * _LANE)) * _LANE        # lane width for ~2 tiles
    tbl = min(max(two_tile, _LANE), _MAX_TBL)
    n_tiles = -(-batch // (8 * tbl))
    return tbl, n_tiles


@jax.jit
def mymodule_forward(x, params_flat):
    B, F = x.shape
    assert F == FEATURES
    tbl, n_tiles = _choose_tile(B)
    m = n_tiles * tbl        # lanes per sublane row over the whole padded batch
    bp = 8 * m               # padded batch size

    # ONE fused relayout pass: pad + reshape + transpose -> (F, 8, bp/8) feature
    # planes, sample b living at (sublane, lane) = (b // m, b % m).  The kernel
    # needs no further relayout and the output reshapes back to batch order free.
    xp = jnp.pad(x, ((0, bp - B), (0, 0)))
    xt = jnp.transpose(xp.reshape(8, m, FEATURES), (2, 0, 1))

    out = pl.pallas_call(
        mlp_kernel,
        out_shape=jax.ShapeDtypeStruct((8, m), jnp.float32),
        grid_spec=pltpu.PrefetchScalarGridSpec(
            num_scalar_prefetch=0,
            grid=(n_tiles,),
            in_specs=[
                pl.BlockSpec((FEATURES, 8, tbl), lambda i: (0, 0, i)),   # x planes
                pl.BlockSpec(memory_space=pltpu.MemorySpace.SMEM),       # params
            ],
            out_specs=pl.BlockSpec((8, tbl), lambda i: (0, i)),
        ),
        compiler_params=pltpu.CompilerParams(
            dimension_semantics=("parallel",),   # megacore on v7x when n_tiles >= 2
        ),
    )(xt, params_flat)

    return out.reshape(bp)[:B].reshape(B, 1)


def init_params(key):
    # Deterministic synthetic init (uniform, roughly torch Linear default scale),
    # kept in torch orientation: w is (out, in), b is (out,).
    def linear(key, fan_in, fan_out):
        kw, kb = jax.random.split(key)
        bound = 1.0 / (fan_in ** 0.5)
        w = jax.random.uniform(kw, (fan_out, fan_in), jnp.float32, -bound, bound)
        b = jax.random.uniform(kb, (fan_out,), jnp.float32, -bound, bound)
        return w, b

    k1, k2, k3 = jax.random.split(key, 3)
    w1, b1 = linear(k1, FEATURES, H1)
    w2, b2 = linear(k2, H1, H2)
    w3, b3 = linear(k3, H2, OUT)
    return (w1, b1, w2, b2, w3, b3)


def ref_forward(x, raw):
    w1, b1, w2, b2, w3, b3 = raw
    hp = jax.lax.Precision.HIGHEST  # keep the reference f32-exact on TPU
    s = lambda t: 1.0 / (1.0 + jnp.exp(-t))
    h1 = s(jnp.dot(x, w1.T, precision=hp) + b1)
    h2 = s(jnp.dot(h1, w2.T, precision=hp) + b2)
    h3 = s(jnp.dot(h2, w3.T, precision=hp) + b3)
    return h3


# TODO(synk): only the forward pass is implemented; CSV loading, Dataset/DataLoader,
# BCE loss and the SGD training loop from the original script are out of scope.

if __name__ == "__main__":
    key = jax.random.PRNGKey(0)
    kx, kp = jax.random.split(key)

    B = 600  # deliberately not a tile multiple to exercise the padded tail
    x = jax.random.normal(kx, (B, FEATURES), dtype=jnp.float32)
    raw = init_params(kp)
    params = pack_params(*raw)
    assert params.shape == (P_LEN,)

    out = mymodule_forward(x, params)
    out = jax.block_until_ready(out)

    ref = ref_forward(x, raw)
    assert out.shape == (B, OUT)
    max_err = float(jnp.max(jnp.abs(out - ref)))
    assert jnp.allclose(out, ref, atol=5e-4, rtol=5e-4), max_err

    print("KERNEL_OK")
</pallas_src>

<mosaic_0001>
module attributes {stable_mosaic.version = 11 : i64} {
  func.func @mlp_kernel(%arg0: i32, %arg1: memref<9x8x128xf32, #tpu.memory_space<vmem>>, %arg2: memref<93xf32, #tpu.memory_space<smem>>, %arg3: memref<8x128xf32, #tpu.memory_space<vmem>>) attributes {dimension_semantics = [#tpu.dimension_semantics<parallel>], iteration_bounds = array<i64: 1>, scalar_prefetch = 0 : i64, scratch_operands = 0 : i64, tpu.core_type = #tpu.core_type<tc>, window_params = [{transform_indices = @transform_0, window_bounds = array<i64: 9, 8, 128>}, {transform_indices = @transform_1, window_bounds = array<i64: 93>}, {transform_indices = @transform_2, window_bounds = array<i64: 8, 128>}]} {
    %c0 = arith.constant 0 : index
    %c0_0 = arith.constant 0 : index
    %c0_1 = arith.constant 0 : index
    %0 = vector.load %arg1[%c0, %c0_0, %c0_1] : memref<9x8x128xf32, #tpu.memory_space<vmem>>, vector<1x8x128xf32>
    %1 = vector.shape_cast %0 : vector<1x8x128xf32> to vector<8x128xf32>
    %c0_2 = arith.constant 0 : index
    %2 = memref.load %arg2[%c0_2] : memref<93xf32, #tpu.memory_space<smem>>
    %3 = vector.broadcast %2 : f32 to vector<8x128xf32>
    %4 = arith.mulf %1, %3 : vector<8x128xf32>
    %c54 = arith.constant 54 : index
    %5 = memref.load %arg2[%c54] : memref<93xf32, #tpu.memory_space<smem>>
    %6 = vector.broadcast %5 : f32 to vector<8x128xf32>
    %7 = arith.addf %4, %6 : vector<8x128xf32>
    %c1 = arith.constant 1 : index
    %c0_3 = arith.constant 0 : index
    %c0_4 = arith.constant 0 : index
    %8 = vector.load %arg1[%c1, %c0_3, %c0_4] : memref<9x8x128xf32, #tpu.memory_space<vmem>>, vector<1x8x128xf32>
    %9 = vector.shape_cast %8 : vector<1x8x128xf32> to vector<8x128xf32>
    %c1_5 = arith.constant 1 : index
    %10 = memref.load %arg2[%c1_5] : memref<93xf32, #tpu.memory_space<smem>>
    %11 = vector.broadcast %10 : f32 to vector<8x128xf32>
    %12 = arith.mulf %9, %11 : vector<8x128xf32>
    %13 = arith.addf %7, %12 : vector<8x128xf32>
    %c2 = arith.constant 2 : index
    %c0_6 = arith.constant 0 : index
    %c0_7 = arith.constant 0 : index
    %14 = vector.load %arg1[%c2, %c0_6, %c0_7] : memref<9x8x128xf32, #tpu.memory_space<vmem>>, vector<1x8x128xf32>
    %15 = vector.shape_cast %14 : vector<1x8x128xf32> to vector<8x128xf32>
    %c2_8 = arith.constant 2 : index
    %16 = memref.load %arg2[%c2_8] : memref<93xf32, #tpu.memory_space<smem>>
    %17 = vector.broadcast %16 : f32 to vector<8x128xf32>
    %18 = arith.mulf %15, %17 : vector<8x128xf32>
    %19 = arith.addf %13, %18 : vector<8x128xf32>
    %c3 = arith.constant 3 : index
    %c0_9 = arith.constant 0 : index
    %c0_10 = arith.constant 0 : index
    %20 = vector.load %arg1[%c3, %c0_9, %c0_10] : memref<9x8x128xf32, #tpu.memory_space<vmem>>, vector<1x8x128xf32>
    %21 = vector.shape_cast %20 : vector<1x8x128xf32> to vector<8x128xf32>
    %c3_11 = arith.constant 3 : index
    %22 = memref.load %arg2[%c3_11] : memref<93xf32, #tpu.memory_space<smem>>
    %23 = vector.broadcast %22 : f32 to vector<8x128xf32>
    %24 = arith.mulf %21, %23 : vector<8x128xf32>
    %25 = arith.addf %19, %24 : vector<8x128xf32>
    %c4 = arith.constant 4 : index
    %c0_12 = arith.constant 0 : index
    %c0_13 = arith.constant 0 : index
    %26 = vector.load %arg1[%c4, %c0_12, %c0_13] : memref<9x8x128xf32, #tpu.memory_space<vmem>>, vector<1x8x128xf32>
    %27 = vector.shape_cast %26 : vector<1x8x128xf32> to vector<8x128xf32>
    %c4_14 = arith.constant 4 : index
    %28 = memref.load %arg2[%c4_14] : memref<93xf32, #tpu.memory_space<smem>>
    %29 = vector.broadcast %28 : f32 to vector<8x128xf32>
    %30 = arith.mulf %27, %29 : vector<8x128xf32>
    %31 = arith.addf %25, %30 : vector<8x128xf32>
    %c5 = arith.constant 5 : index
    %c0_15 = arith.constant 0 : index
    %c0_16 = arith.constant 0 : index
    %32 = vector.load %arg1[%c5, %c0_15, %c0_16] : memref<9x8x128xf32, #tpu.memory_space<vmem>>, vector<1x8x128xf32>
    %33 = vector.shape_cast %32 : vector<1x8x128xf32> to vector<8x128xf32>
    %c5_17 = arith.constant 5 : index
    %34 = memref.load %arg2[%c5_17] : memref<93xf32, #tpu.memory_space<smem>>
    %35 = vector.broadcast %34 : f32 to vector<8x128xf32>
    %36 = arith.mulf %33, %35 : vector<8x128xf32>
    %37 = arith.addf %31, %36 : vector<8x128xf32>
    %c6 = arith.constant 6 : index
    %c0_18 = arith.constant 0 : index
    %c0_19 = arith.constant 0 : index
    %38 = vector.load %arg1[%c6, %c0_18, %c0_19] : memref<9x8x128xf32, #tpu.memory_space<vmem>>, vector<1x8x128xf32>
    %39 = vector.shape_cast %38 : vector<1x8x128xf32> to vector<8x128xf32>
    %c6_20 = arith.constant 6 : index
    %40 = memref.load %arg2[%c6_20] : memref<93xf32, #tpu.memory_space<smem>>
    %41 = vector.broadcast %40 : f32 to vector<8x128xf32>
    %42 = arith.mulf %39, %41 : vector<8x128xf32>
    %43 = arith.addf %37, %42 : vector<8x128xf32>
    %c7 = arith.constant 7 : index
    %c0_21 = arith.constant 0 : index
    %c0_22 = arith.constant 0 : index
    %44 = vector.load %arg1[%c7, %c0_21, %c0_22] : memref<9x8x128xf32, #tpu.memory_space<vmem>>, vector<1x8x128xf32>
    %45 = vector.shape_cast %44 : vector<1x8x128xf32> to vector<8x128xf32>
    %c7_23 = arith.constant 7 : index
    %46 = memref.load %arg2[%c7_23] : memref<93xf32, #tpu.memory_space<smem>>
    %47 = vector.broadcast %46 : f32 to vector<8x128xf32>
    %48 = arith.mulf %45, %47 : vector<8x128xf32>
    %49 = arith.addf %43, %48 : vector<8x128xf32>
    %c8 = arith.constant 8 : index
    %c0_24 = arith.constant 0 : index
    %c0_25 = arith.constant 0 : index
    %50 = vector.load %arg1[%c8, %c0_24, %c0_25] : memref<9x8x128xf32, #tpu.memory_space<vmem>>, vector<1x8x128xf32>
    %51 = vector.shape_cast %50 : vector<1x8x128xf32> to vector<8x128xf32>
    %c8_26 = arith.constant 8 : index
    %52 = memref.load %arg2[%c8_26] : memref<93xf32, #tpu.memory_space<smem>>
    %53 = vector.broadcast %52 : f32 to vector<8x128xf32>
    %54 = arith.mulf %51, %53 : vector<8x128xf32>
    %55 = arith.addf %49, %54 : vector<8x128xf32>
    %cst = arith.constant 5.000000e-01 : f32
    %56 = vector.broadcast %cst : f32 to vector<8x128xf32>
    %57 = arith.mulf %56, %55 : vector<8x128xf32>
    %58 = math.tanh %57 : vector<8x128xf32>
    %cst_27 = arith.constant 5.000000e-01 : f32
    %59 = vector.broadcast %cst_27 : f32 to vector<8x128xf32>
    %60 = arith.mulf %59, %58 : vector<8x128xf32>
    %cst_28 = arith.constant 5.000000e-01 : f32
    %61 = vector.broadcast %cst_28 : f32 to vector<8x128xf32>
    %62 = arith.addf %60, %61 : vector<8x128xf32>
    %c0_29 = arith.constant 0 : index
    %c0_30 = arith.constant 0 : index
    %c0_31 = arith.constant 0 : index
    %63 = vector.load %arg1[%c0_29, %c0_30, %c0_31] : memref<9x8x128xf32, #tpu.memory_space<vmem>>, vector<1x8x128xf32>
    %64 = vector.shape_cast %63 : vector<1x8x128xf32> to vector<8x128xf32>
    %c9 = arith.constant 9 : index
    %65 = memref.load %arg2[%c9] : memref<93xf32, #tpu.memory_space<smem>>
    %66 = vector.broadcast %65 : f32 to vector<8x128xf32>
    %67 = arith.mulf %64, %66 : vector<8x128xf32>
    %c55 = arith.constant 55 : index
    %68 = memref.load %arg2[%c55] : memref<93xf32, #tpu.memory_space<smem>>
    %69 = vector.broadcast %68 : f32 to vector<8x128xf32>
    %70 = arith.addf %67, %69 : vector<8x128xf32>
    %c1_32 = arith.constant 1 : index
    %c0_33 = arith.constant 0 : index
    %c0_34 = arith.constant 0 : index
    %71 = vector.load %arg1[%c1_32, %c0_33, %c0_34] : memref<9x8x128xf32, #tpu.memory_space<vmem>>, vector<1x8x128xf32>
    %72 = vector.shape_cast %71 : vector<1x8x128xf32> to vector<8x128xf32>
    %c10 = arith.constant 10 : index
    %73 = memref.load %arg2[%c10] : memref<93xf32, #tpu.memory_space<smem>>
    %74 = vector.broadcast %73 : f32 to vector<8x128xf32>
    %75 = arith.mulf %72, %74 : vector<8x128xf32>
    %76 = arith.addf %70, %75 : vector<8x128xf32>
    %c2_35 = arith.constant 2 : index
    %c0_36 = arith.constant 0 : index
    %c0_37 = arith.constant 0 : index
    %77 = vector.load %arg1[%c2_35, %c0_36, %c0_37] : memref<9x8x128xf32, #tpu.memory_space<vmem>>, vector<1x8x128xf32>
    %78 = vector.shape_cast %77 : vector<1x8x128xf32> to vector<8x128xf32>
    %c11 = arith.constant 11 : index
    %79 = memref.load %arg2[%c11] : memref<93xf32, #tpu.memory_space<smem>>
    %80 = vector.broadcast %79 : f32 to vector<8x128xf32>
    %81 = arith.mulf %78, %80 : vector<8x128xf32>
    %82 = arith.addf %76, %81 : vector<8x128xf32>
    %c3_38 = arith.constant 3 : index
    %c0_39 = arith.constant 0 : index
    %c0_40 = arith.constant 0 : index
    %83 = vector.load %arg1[%c3_38, %c0_39, %c0_40] : memref<9x8x128xf32, #tpu.memory_space<vmem>>, vector<1x8x128xf32>
    %84 = vector.shape_cast %83 : vector<1x8x128xf32> to vector<8x128xf32>
    %c12 = arith.constant 12 : index
    %85 = memref.load %arg2[%c12] : memref<93xf32, #tpu.memory_space<smem>>
    %86 = vector.broadcast %85 : f32 to vector<8x128xf32>
    %87 = arith.mulf %84, %86 : vector<8x128xf32>
    %88 = arith.addf %82, %87 : vector<8x128xf32>
    %c4_41 = arith.constant 4 : index
    %c0_42 = arith.constant 0 : index
    %c0_43 = arith.constant 0 : index
    %89 = vector.load %arg1[%c4_41, %c0_42, %c0_43] : memref<9x8x128xf32, #tpu.memory_space<vmem>>, vector<1x8x128xf32>
    %90 = vector.shape_cast %89 : vector<1x8x128xf32> to vector<8x128xf32>
    %c13 = arith.constant 13 : index
    %91 = memref.load %arg2[%c13] : memref<93xf32, #tpu.memory_space<smem>>
    %92 = vector.broadcast %91 : f32 to vector<8x128xf32>
    %93 = arith.mulf %90, %92 : vector<8x128xf32>
    %94 = arith.addf %88, %93 : vector<8x128xf32>
    %c5_44 = arith.constant 5 : index
    %c0_45 = arith.constant 0 : index
    %c0_46 = arith.constant 0 : index
    %95 = vector.load %arg1[%c5_44, %c0_45, %c0_46] : memref<9x8x128xf32, #tpu.memory_space<vmem>>, vector<1x8x128xf32>
    %96 = vector.shape_cast %95 : vector<1x8x128xf32> to vector<8x128xf32>
    %c14 = arith.constant 14 : index
    %97 = memref.load %arg2[%c14] : memref<93xf32, #tpu.memory_space<smem>>
    %98 = vector.broadcast %97 : f32 to vector<8x128xf32>
    %99 = arith.mulf %96, %98 : vector<8x128xf32>
    %100 = arith.addf %94, %99 : vector<8x128xf32>
    %c6_47 = arith.constant 6 : index
    %c0_48 = arith.constant 0 : index
    %c0_49 = arith.constant 0 : index
    %101 = vector.load %arg1[%c6_47, %c0_48, %c0_49] : memref<9x8x128xf32, #tpu.memory_space<vmem>>, vector<1x8x128xf32>
    %102 = vector.shape_cast %101 : vector<1x8x128xf32> to vector<8x128xf32>
    %c15 = arith.constant 15 : index
    %103 = memref.load %arg2[%c15] : memref<93xf32, #tpu.memory_space<smem>>
    %104 = vector.broadcast %103 : f32 to vector<8x128xf32>
    %105 = arith.mulf %102, %104 : vector<8x128xf32>
    %106 = arith.addf %100, %105 : vector<8x128xf32>
    %c7_50 = arith.constant 7 : index
    %c0_51 = arith.constant 0 : index
    %c0_52 = arith.constant 0 : index
    %107 = vector.load %arg1[%c7_50, %c0_51, %c0_52] : memref<9x8x128xf32, #tpu.memory_space<vmem>>, vector<1x8x128xf32>
    %108 = vector.shape_cast %107 : vector<1x8x128xf32> to vector<8x128xf32>
    %c16 = arith.constant 16 : index
    %109 = memref.load %arg2[%c16] : memref<93xf32, #tpu.memory_space<smem>>
    %110 = vector.broadcast %109 : f32 to vector<8x128xf32>
    %111 = arith.mulf %108, %110 : vector<8x128xf32>
    %112 = arith.addf %106, %111 : vector<8x128xf32>
    %c8_53 = arith.constant 8 : index
    %c0_54 = arith.constant 0 : index
    %c0_55 = arith.constant 0 : index
    %113 = vector.load %arg1[%c8_53, %c0_54, %c0_55] : memref<9x8x128xf32, #tpu.memory_space<vmem>>, vector<1x8x128xf32>
    %114 = vector.shape_cast %113 : vector<1x8x128xf32> to vector<8x128xf32>
    %c17 = arith.constant 17 : index
    %115 = memref.load %arg2[%c17] : memref<93xf32, #tpu.memory_space<smem>>
    %116 = vector.broadcast %115 : f32 to vector<8x128xf32>
    %117 = arith.mulf %114, %116 : vector<8x128xf32>
    %118 = arith.addf %112, %117 : vector<8x128xf32>
    %cst_56 = arith.constant 5.000000e-01 : f32
    %119 = vector.broadcast %cst_56 : f32 to vector<8x128xf32>
    %120 = arith.mulf %119, %118 : vector<8x128xf32>
    %121 = math.tanh %120 : vector<8x128xf32>
    %cst_57 = arith.constant 5.000000e-01 : f32
    %122 = vector.broadcast %cst_57 : f32 to vector<8x128xf32>
    %123 = arith.mulf %122, %121 : vector<8x128xf32>
    %cst_58 = arith.constant 5.000000e-01 : f32
    %124 = vector.broadcast %cst_58 : f32 to vector<8x128xf32>
    %125 = arith.addf %123, %124 : vector<8x128xf32>
    %c0_59 = arith.constant 0 : index
    %c0_60 = arith.constant 0 : index
    %c0_61 = arith.constant 0 : index
    %126 = vector.load %arg1[%c0_59, %c0_60, %c0_61] : memref<9x8x128xf32, #tpu.memory_space<vmem>>, vector<1x8x128xf32>
    %127 = vector.shape_cast %126 : vector<1x8x128xf32> to vector<8x128xf32>
    %c18 = arith.constant 18 : index
    %128 = memref.load %arg2[%c18] : memref<93xf32, #tpu.memory_space<smem>>
    %129 = vector.broadcast %128 : f32 to vector<8x128xf32>
    %130 = arith.mulf %127, %129 : vector<8x128xf32>
    %c56 = arith.constant 56 : index
    %131 = memref.load %arg2[%c56] : memref<93xf32, #tpu.memory_space<smem>>
    %132 = vector.broadcast %131 : f32 to vector<8x128xf32>
    %133 = arith.addf %130, %132 : vector<8x128xf32>
    %c1_62 = arith.constant 1 : index
    %c0_63 = arith.constant 0 : index
    %c0_64 = arith.constant 0 : index
    %134 = vector.load %arg1[%c1_62, %c0_63, %c0_64] : memref<9x8x128xf32, #tpu.memory_space<vmem>>, vector<1x8x128xf32>
    %135 = vector.shape_cast %134 : vector<1x8x128xf32> to vector<8x128xf32>
    %c19 = arith.constant 19 : index
    %136 = memref.load %arg2[%c19] : memref<93xf32, #tpu.memory_space<smem>>
    %137 = vector.broadcast %136 : f32 to vector<8x128xf32>
    %138 = arith.mulf %135, %137 : vector<8x128xf32>
    %139 = arith.addf %133, %138 : vector<8x128xf32>
    %c2_65 = arith.constant 2 : index
    %c0_66 = arith.constant 0 : index
    %c0_67 = arith.constant 0 : index
    %140 = vector.load %arg1[%c2_65, %c0_66, %c0_67] : memref<9x8x128xf32, #tpu.memory_space<vmem>>, vector<1x8x128xf32>
    %141 = vector.shape_cast %140 : vector<1x8x128xf32> to vector<8x128xf32>
    %c20 = arith.constant 20 : index
    %142 = memref.load %arg2[%c20] : memref<93xf32, #tpu.memory_space<smem>>
    %143 = vector.broadcast %142 : f32 to vector<8x128xf32>
    %144 = arith.mulf %141, %143 : vector<8x128xf32>
    %145 = arith.addf %139, %144 : vector<8x128xf32>
    %c3_68 = arith.constant 3 : index
    %c0_69 = arith.constant 0 : index
    %c0_70 = arith.constant 0 : index
    %146 = vector.load %arg1[%c3_68, %c0_69, %c0_70] : memref<9x8x128xf32, #tpu.memory_space<vmem>>, vector<1x8x128xf32>
    %147 = vector.shape_cast %146 : vector<1x8x128xf32> to vector<8x128xf32>
    %c21 = arith.constant 21 : index
    %148 = memref.load %arg2[%c21] : memref<93xf32, #tpu.memory_space<smem>>
    %149 = vector.broadcast %148 : f32 to vector<8x128xf32>
    %150 = arith.mulf %147, %149 : vector<8x128xf32>
    %151 = arith.addf %145, %150 : vector<8x128xf32>
    %c4_71 = arith.constant 4 : index
    %c0_72 = arith.constant 0 : index
    %c0_73 = arith.constant 0 : index
    %152 = vector.load %arg1[%c4_71, %c0_72, %c0_73] : memref<9x8x128xf32, #tpu.memory_space<vmem>>, vector<1x8x128xf32>
    %153 = vector.shape_cast %152 : vector<1x8x128xf32> to vector<8x128xf32>
    %c22 = arith.constant 22 : index
    %154 = memref.load %arg2[%c22] : memref<93xf32, #tpu.memory_space<smem>>
    %155 = vector.broadcast %154 : f32 to vector<8x128xf32>
    %156 = arith.mulf %153, %155 : vector<8x128xf32>
    %157 = arith.addf %151, %156 : vector<8x128xf32>
    %c5_74 = arith.constant 5 : index
    %c0_75 = arith.constant 0 : index
    %c0_76 = arith.constant 0 : index
    %158 = vector.load %arg1[%c5_74, %c0_75, %c0_76] : memref<9x8x128xf32, #tpu.memory_space<vmem>>, vector<1x8x128xf32>
    %159 = vector.shape_cast %158 : vector<1x8x128xf32> to vector<8x128xf32>
    %c23 = arith.constant 23 : index
    %160 = memref.load %arg2[%c23] : memref<93xf32, #tpu.memory_space<smem>>
    %161 = vector.broadcast %160 : f32 to vector<8x128xf32>
    %162 = arith.mulf %159, %161 : vector<8x128xf32>
    %163 = arith.addf %157, %162 : vector<8x128xf32>
    %c6_77 = arith.constant 6 : index
    %c0_78 = arith.constant 0 : index
    %c0_79 = arith.constant 0 : index
    %164 = vector.load %arg1[%c6_77, %c0_78, %c0_79] : memref<9x8x128xf32, #tpu.memory_space<vmem>>, vector<1x8x128xf32>
    %165 = vector.shape_cast %164 : vector<1x8x128xf32> to vector<8x128xf32>
    %c24 = arith.constant 24 : index
    %166 = memref.load %arg2[%c24] : memref<93xf32, #tpu.memory_space<smem>>
    %167 = vector.broadcast %166 : f32 to vector<8x128xf32>
    %168 = arith.mulf %165, %167 : vector<8x128xf32>
    %169 = arith.addf %163, %168 : vector<8x128xf32>
    %c7_80 = arith.constant 7 : index
    %c0_81 = arith.constant 0 : index
    %c0_82 = arith.constant 0 : index
    %170 = vector.load %arg1[%c7_80, %c0_81, %c0_82] : memref<9x8x128xf32, #tpu.memory_space<vmem>>, vector<1x8x128xf32>
    %171 = vector.shape_cast %170 : vector<1x8x128xf32> to vector<8x128xf32>
    %c25 = arith.constant 25 : index
    %172 = memref.load %arg2[%c25] : memref<93xf32, #tpu.memory_space<smem>>
    %173 = vector.broadcast %172 : f32 to vector<8x128xf32>
    %174 = arith.mulf %171, %173 : vector<8x128xf32>
    %175 = arith.addf %169, %174 : vector<8x128xf32>
    %c8_83 = arith.constant 8 : index
    %c0_84 = arith.constant 0 : index
    %c0_85 = arith.constant 0 : index
    %176 = vector.load %arg1[%c8_83, %c0_84, %c0_85] : memref<9x8x128xf32, #tpu.memory_space<vmem>>, vector<1x8x128xf32>
    %177 = vector.shape_cast %176 : vector<1x8x128xf32> to vector<8x128xf32>
    %c26 = arith.constant 26 : index
    %178 = memref.load %arg2[%c26] : memref<93xf32, #tpu.memory_space<smem>>
    %179 = vector.broadcast %178 : f32 to vector<8x128xf32>
    %180 = arith.mulf %177, %179 : vector<8x128xf32>
    %181 = arith.addf %175, %180 : vector<8x128xf32>
    %cst_86 = arith.constant 5.000000e-01 : f32
    %182 = vector.broadcast %cst_86 : f32 to vector<8x128xf32>
    %183 = arith.mulf %182, %181 : vector<8x128xf32>
    %184 = math.tanh %183 : vector<8x128xf32>
    %cst_87 = arith.constant 5.000000e-01 : f32
    %185 = vector.broadcast %cst_87 : f32 to vector<8x128xf32>
    %186 = arith.mulf %185, %184 : vector<8x128xf32>
    %cst_88 = arith.constant 5.000000e-01 : f32
    %187 = vector.broadcast %cst_88 : f32 to vector<8x128xf32>
    %188 = arith.addf %186, %187 : vector<8x128xf32>
    %c0_89 = arith.constant 0 : index
    %c0_90 = arith.constant 0 : index
    %c0_91 = arith.constant 0 : index
    %189 = vector.load %arg1[%c0_89, %c0_90, %c0_91] : memref<9x8x128xf32, #tpu.memory_space<vmem>>, vector<1x8x128xf32>
    %190 = vector.shape_cast %189 : vector<1x8x128xf32> to vector<8x128xf32>
    %c27 = arith.constant 27 : index
    %191 = memref.load %arg2[%c27] : memref<93xf32, #tpu.memory_space<smem>>
    %192 = vector.broadcast %191 : f32 to vector<8x128xf32>
    %193 = arith.mulf %190, %192 : vector<8x128xf32>
    %c57 = arith.constant 57 : index
    %194 = memref.load %arg2[%c57] : memref<93xf32, #tpu.memory_space<smem>>
    %195 = vector.broadcast %194 : f32 to vector<8x128xf32>
    %196 = arith.addf %193, %195 : vector<8x128xf32>
    %c1_92 = arith.constant 1 : index
    %c0_93 = arith.constant 0 : index
    %c0_94 = arith.constant 0 : index
    %197 = vector.load %arg1[%c1_92, %c0_93, %c0_94] : memref<9x8x128xf32, #tpu.memory_space<vmem>>, vector<1x8x128xf32>
    %198 = vector.shape_cast %197 : vector<1x8x128xf32> to vector<8x128xf32>
    %c28 = arith.constant 28 : index
    %199 = memref.load %arg2[%c28] : memref<93xf32, #tpu.memory_space<smem>>
    %200 = vector.broadcast %199 : f32 to vector<8x128xf32>
    %201 = arith.mulf %198, %200 : vector<8x128xf32>
    %202 = arith.addf %196, %201 : vector<8x128xf32>
    %c2_95 = arith.constant 2 : index
    %c0_96 = arith.constant 0 : index
    %c0_97 = arith.constant 0 : index
    %203 = vector.load %arg1[%c2_95, %c0_96, %c0_97] : memref<9x8x128xf32, #tpu.memory_space<vmem>>, vector<1x8x128xf32>
    %204 = vector.shape_cast %203 : vector<1x8x128xf32> to vector<8x128xf32>
    %c29 = arith.constant 29 : index
    %205 = memref.load %arg2[%c29] : memref<93xf32, #tpu.memory_space<smem>>
    %206 = vector.broadcast %205 : f32 to vector<8x128xf32>
    %207 = arith.mulf %204, %206 : vector<8x128xf32>
    %208 = arith.addf %202, %207 : vector<8x128xf32>
    %c3_98 = arith.constant 3 : index
    %c0_99 = arith.constant 0 : index
    %c0_100 = arith.constant 0 : index
    %209 = vector.load %arg1[%c3_98, %c0_99, %c0_100] : memref<9x8x128xf32, #tpu.memory_space<vmem>>, vector<1x8x128xf32>
    %210 = vector.shape_cast %209 : vector<1x8x128xf32> to vector<8x128xf32>
    %c30 = arith.constant 30 : index
    %211 = memref.load %arg2[%c30] : memref<93xf32, #tpu.memory_space<smem>>
    %212 = vector.broadcast %211 : f32 to vector<8x128xf32>
    %213 = arith.mulf %210, %212 : vector<8x128xf32>
    %214 = arith.addf %208, %213 : vector<8x128xf32>
    %c4_101 = arith.constant 4 : index
    %c0_102 = arith.constant 0 : index
    %c0_103 = arith.constant 0 : index
    %215 = vector.load %arg1[%c4_101, %c0_102, %c0_103] : memref<9x8x128xf32, #tpu.memory_space<vmem>>, vector<1x8x128xf32>
    %216 = vector.shape_cast %215 : vector<1x8x128xf32> to vector<8x128xf32>
    %c31 = arith.constant 31 : index
    %217 = memref.load %arg2[%c31] : memref<93xf32, #tpu.memory_space<smem>>
    %218 = vector.broadcast %217 : f32 to vector<8x128xf32>
    %219 = arith.mulf %216, %218 : vector<8x128xf32>
    %220 = arith.addf %214, %219 : vector<8x128xf32>
    %c5_104 = arith.constant 5 : index
    %c0_105 = arith.constant 0 : index
    %c0_106 = arith.constant 0 : index
    %221 = vector.load %arg1[%c5_104, %c0_105, %c0_106] : memref<9x8x128xf32, #tpu.memory_space<vmem>>, vector<1x8x128xf32>
    %222 = vector.shape_cast %221 : vector<1x8x128xf32> to vector<8x128xf32>
    %c32 = arith.constant 32 : index
    %223 = memref.load %arg2[%c32] : memref<93xf32, #tpu.memory_space<smem>>
    %224 = vector.broadcast %223 : f32 to vector<8x128xf32>
    %225 = arith.mulf %222, %224 : vector<8x128xf32>
    %226 = arith.addf %220, %225 : vector<8x128xf32>
    %c6_107 = arith.constant 6 : index
    %c0_108 = arith.constant 0 : index
    %c0_109 = arith.constant 0 : index
    %227 = vector.load %arg1[%c6_107, %c0_108, %c0_109] : memref<9x8x128xf32, #tpu.memory_space<vmem>>, vector<1x8x128xf32>
    %228 = vector.shape_cast %227 : vector<1x8x128xf32> to vector<8x128xf32>
    %c33 = arith.constant 33 : index
    %229 = memref.load %arg2[%c33] : memref<93xf32, #tpu.memory_space<smem>>
    %230 = vector.broadcast %229 : f32 to vector<8x128xf32>
    %231 = arith.mulf %228, %230 : vector<8x128xf32>
    %232 = arith.addf %226, %231 : vector<8x128xf32>
    %c7_110 = arith.constant 7 : index
    %c0_111 = arith.constant 0 : index
    %c0_112 = arith.constant 0 : index
    %233 = vector.load %arg1[%c7_110, %c0_111, %c0_112] : memref<9x8x128xf32, #tpu.memory_space<vmem>>, vector<1x8x128xf32>
    %234 = vector.shape_cast %233 : vector<1x8x128xf32> to vector<8x128xf32>
    %c34 = arith.constant 34 : index
    %235 = memref.load %arg2[%c34] : memref<93xf32, #tpu.memory_space<smem>>
    %236 = vector.broadcast %235 : f32 to vector<8x128xf32>
    %237 = arith.mulf %234, %236 : vector<8x128xf32>
    %238 = arith.addf %232, %237 : vector<8x128xf32>
    %c8_113 = arith.constant 8 : index
    %c0_114 = arith.constant 0 : index
    %c0_115 = arith.constant 0 : index
    %239 = vector.load %arg1[%c8_113, %c0_114, %c0_115] : memref<9x8x128xf32, #tpu.memory_space<vmem>>, vector<1x8x128xf32>
    %240 = vector.shape_cast %239 : vector<1x8x128xf32> to vector<8x128xf32>
    %c35 = arith.constant 35 : index
    %241 = memref.load %arg2[%c35] : memref<93xf32, #tpu.memory_space<smem>>
    %242 = vector.broadcast %241 : f32 to vector<8x128xf32>
    %243 = arith.mulf %240, %242 : vector<8x128xf32>
    %244 = arith.addf %238, %243 : vector<8x128xf32>
    %cst_116 = arith.constant 5.000000e-01 : f32
    %245 = vector.broadcast %cst_116 : f32 to vector<8x128xf32>
    %246 = arith.mulf %245, %244 : vector<8x128xf32>
    %247 = math.tanh %246 : vector<8x128xf32>
    %cst_117 = arith.constant 5.000000e-01 : f32
    %248 = vector.broadcast %cst_117 : f32 to vector<8x128xf32>
    %249 = arith.mulf %248, %247 : vector<8x128xf32>
    %cst_118 = arith.constant 5.000000e-01 : f32
    %250 = vector.broadcast %cst_118 : f32 to vector<8x128xf32>
    %251 = arith.addf %249, %250 : vector<8x128xf32>
    %c0_119 = arith.constant 0 : index
    %c0_120 = arith.constant 0 : index
    %c0_121 = arith.constant 0 : index
    %252 = vector.load %arg1[%c0_119, %c0_120, %c0_121] : memref<9x8x128xf32, #tpu.memory_space<vmem>>, vector<1x8x128xf32>
    %253 = vector.shape_cast %252 : vector<1x8x128xf32> to vector<8x128xf32>
    %c36 = arith.constant 36 : index
    %254 = memref.load %arg2[%c36] : memref<93xf32, #tpu.memory_space<smem>>
    %255 = vector.broadcast %254 : f32 to vector<8x128xf32>
    %256 = arith.mulf %253, %255 : vector<8x128xf32>
    %c58 = arith.constant 58 : index
    %257 = memref.load %arg2[%c58] : memref<93xf32, #tpu.memory_space<smem>>
    %258 = vector.broadcast %257 : f32 to vector<8x128xf32>
    %259 = arith.addf %256, %258 : vector<8x128xf32>
    %c1_122 = arith.constant 1 : index
    %c0_123 = arith.constant 0 : index
    %c0_124 = arith.constant 0 : index
    %260 = vector.load %arg1[%c1_122, %c0_123, %c0_124] : memref<9x8x128xf32, #tpu.memory_space<vmem>>, vector<1x8x128xf32>
    %261 = vector.shape_cast %260 : vector<1x8x128xf32> to vector<8x128xf32>
    %c37 = arith.constant 37 : index
    %262 = memref.load %arg2[%c37] : memref<93xf32, #tpu.memory_space<smem>>
    %263 = vector.broadcast %262 : f32 to vector<8x128xf32>
    %264 = arith.mulf %261, %263 : vector<8x128xf32>
    %265 = arith.addf %259, %264 : vector<8x128xf32>
    %c2_125 = arith.constant 2 : index
    %c0_126 = arith.constant 0 : index
    %c0_127 = arith.constant 0 : index
    %266 = vector.load %arg1[%c2_125, %c0_126, %c0_127] : memref<9x8x128xf32, #tpu.memory_space<vmem>>, vector<1x8x128xf32>
    %267 = vector.shape_cast %266 : vector<1x8x128xf32> to vector<8x128xf32>
    %c38 = arith.constant 38 : index
    %268 = memref.load %arg2[%c38] : memref<93xf32, #tpu.memory_space<smem>>
    %269 = vector.broadcast %268 : f32 to vector<8x128xf32>
    %270 = arith.mulf %267, %269 : vector<8x128xf32>
    %271 = arith.addf %265, %270 : vector<8x128xf32>
    %c3_128 = arith.constant 3 : index
    %c0_129 = arith.constant 0 : index
    %c0_130 = arith.constant 0 : index
    %272 = vector.load %arg1[%c3_128, %c0_129, %c0_130] : memref<9x8x128xf32, #tpu.memory_space<vmem>>, vector<1x8x128xf32>
    %273 = vector.shape_cast %272 : vector<1x8x128xf32> to vector<8x128xf32>
    %c39 = arith.constant 39 : index
    %274 = memref.load %arg2[%c39] : memref<93xf32, #tpu.memory_space<smem>>
    %275 = vector.broadcast %274 : f32 to vector<8x128xf32>
    %276 = arith.mulf %273, %275 : vector<8x128xf32>
    %277 = arith.addf %271, %276 : vector<8x128xf32>
    %c4_131 = arith.constant 4 : index
    %c0_132 = arith.constant 0 : index
    %c0_133 = arith.constant 0 : index
    %278 = vector.load %arg1[%c4_131, %c0_132, %c0_133] : memref<9x8x128xf32, #tpu.memory_space<vmem>>, vector<1x8x128xf32>
    %279 = vector.shape_cast %278 : vector<1x8x128xf32> to vector<8x128xf32>
    %c40 = arith.constant 40 : index
    %280 = memref.load %arg2[%c40] : memref<93xf32, #tpu.memory_space<smem>>
    %281 = vector.broadcast %280 : f32 to vector<8x128xf32>
    %282 = arith.mulf %279, %281 : vector<8x128xf32>
    %283 = arith.addf %277, %282 : vector<8x128xf32>
    %c5_134 = arith.constant 5 : index
    %c0_135 = arith.constant 0 : index
    %c0_136 = arith.constant 0 : index
    %284 = vector.load %arg1[%c5_134, %c0_135, %c0_136] : memref<9x8x128xf32, #tpu.memory_space<vmem>>, vector<1x8x128xf32>
    %285 = vector.shape_cast %284 : vector<1x8x128xf32> to vector<8x128xf32>
    %c41 = arith.constant 41 : index
    %286 = memref.load %arg2[%c41] : memref<93xf32, #tpu.memory_space<smem>>
    %287 = vector.broadcast %286 : f32 to vector<8x128xf32>
    %288 = arith.mulf %285, %287 : vector<8x128xf32>
    %289 = arith.addf %283, %288 : vector<8x128xf32>
    %c6_137 = arith.constant 6 : index
    %c0_138 = arith.constant 0 : index
    %c0_139 = arith.constant 0 : index
    %290 = vector.load %arg1[%c6_137, %c0_138, %c0_139] : memref<9x8x128xf32, #tpu.memory_space<vmem>>, vector<1x8x128xf32>
    %291 = vector.shape_cast %290 : vector<1x8x128xf32> to vector<8x128xf32>
    %c42 = arith.constant 42 : index
    %292 = memref.load %arg2[%c42] : memref<93xf32, #tpu.memory_space<smem>>
    %293 = vector.broadcast %292 : f32 to vector<8x128xf32>
    %294 = arith.mulf %291, %293 : vector<8x128xf32>
    %295 = arith.addf %289, %294 : vector<8x128xf32>
    %c7_140 = arith.constant 7 : index
    %c0_141 = arith.constant 0 : index
    %c0_142 = arith.constant 0 : index
    %296 = vector.load %arg1[%c7_140, %c0_141, %c0_142] : memref<9x8x128xf32, #tpu.memory_space<vmem>>, vector<1x8x128xf32>
    %297 = vector.shape_cast %296 : vector<1x8x128xf32> to vector<8x128xf32>
    %c43 = arith.constant 43 : index
    %298 = memref.load %arg2[%c43] : memref<93xf32, #tpu.memory_space<smem>>
    %299 = vector.broadcast %298 : f32 to vector<8x128xf32>
    %300 = arith.mulf %297, %299 : vector<8x128xf32>
    %301 = arith.addf %295, %300 : vector<8x128xf32>
    %c8_143 = arith.constant 8 : index
    %c0_144 = arith.constant 0 : index
    %c0_145 = arith.constant 0 : index
    %302 = vector.load %arg1[%c8_143, %c0_144, %c0_145] : memref<9x8x128xf32, #tpu.memory_space<vmem>>, vector<1x8x128xf32>
    %303 = vector.shape_cast %302 : vector<1x8x128xf32> to vector<8x128xf32>
    %c44 = arith.constant 44 : index
    %304 = memref.load %arg2[%c44] : memref<93xf32, #tpu.memory_space<smem>>
    %305 = vector.broadcast %304 : f32 to vector<8x128xf32>
    %306 = arith.mulf %303, %305 : vector<8x128xf32>
    %307 = arith.addf %301, %306 : vector<8x128xf32>
    %cst_146 = arith.constant 5.000000e-01 : f32
    %308 = vector.broadcast %cst_146 : f32 to vector<8x128xf32>
    %309 = arith.mulf %308, %307 : vector<8x128xf32>
    %310 = math.tanh %309 : vector<8x128xf32>
    %cst_147 = arith.constant 5.000000e-01 : f32
    %311 = vector.broadcast %cst_147 : f32 to vector<8x128xf32>
    %312 = arith.mulf %311, %310 : vector<8x128xf32>
    %cst_148 = arith.constant 5.000000e-01 : f32
    %313 = vector.broadcast %cst_148 : f32 to vector<8x128xf32>
    %314 = arith.addf %312, %313 : vector<8x128xf32>
    %c0_149 = arith.constant 0 : index
    %c0_150 = arith.constant 0 : index
    %c0_151 = arith.constant 0 : index
    %315 = vector.load %arg1[%c0_149, %c0_150, %c0_151] : memref<9x8x128xf32, #tpu.memory_space<vmem>>, vector<1x8x128xf32>
    %316 = vector.shape_cast %315 : vector<1x8x128xf32> to vector<8x128xf32>
    %c45 = arith.constant 45 : index
    %317 = memref.load %arg2[%c45] : memref<93xf32, #tpu.memory_space<smem>>
    %318 = vector.broadcast %317 : f32 to vector<8x128xf32>
    %319 = arith.mulf %316, %318 : vector<8x128xf32>
    %c59 = arith.constant 59 : index
    %320 = memref.load %arg2[%c59] : memref<93xf32, #tpu.memory_space<smem>>
    %321 = vector.broadcast %320 : f32 to vector<8x128xf32>
    %322 = arith.addf %319, %321 : vector<8x128xf32>
    %c1_152 = arith.constant 1 : index
    %c0_153 = arith.constant 0 : index
    %c0_154 = arith.constant 0 : index
    %323 = vector.load %arg1[%c1_152, %c0_153, %c0_154] : memref<9x8x128xf32, #tpu.memory_space<vmem>>, vector<1x8x128xf32>
    %324 = vector.shape_cast %323 : vector<1x8x128xf32> to vector<8x128xf32>
    %c46 = arith.constant 46 : index
    %325 = memref.load %arg2[%c46] : memref<93xf32, #tpu.memory_space<smem>>
    %326 = vector.broadcast %325 : f32 to vector<8x128xf32>
    %327 = arith.mulf %324, %326 : vector<8x128xf32>
    %328 = arith.addf %322, %327 : vector<8x128xf32>
    %c2_155 = arith.constant 2 : index
    %c0_156 = arith.constant 0 : index
    %c0_157 = arith.constant 0 : index
    %329 = vector.load %arg1[%c2_155, %c0_156, %c0_157] : memref<9x8x128xf32, #tpu.memory_space<vmem>>, vector<1x8x128xf32>
    %330 = vector.shape_cast %329 : vector<1x8x128xf32> to vector<8x128xf32>
    %c47 = arith.constant 47 : index
    %331 = memref.load %arg2[%c47] : memref<93xf32, #tpu.memory_space<smem>>
    %332 = vector.broadcast %331 : f32 to vector<8x128xf32>
    %333 = arith.mulf %330, %332 : vector<8x128xf32>
    %334 = arith.addf %328, %333 : vector<8x128xf32>
    %c3_158 = arith.constant 3 : index
    %c0_159 = arith.constant 0 : index
    %c0_160 = arith.constant 0 : index
    %335 = vector.load %arg1[%c3_158, %c0_159, %c0_160] : memref<9x8x128xf32, #tpu.memory_space<vmem>>, vector<1x8x128xf32>
    %336 = vector.shape_cast %335 : vector<1x8x128xf32> to vector<8x128xf32>
    %c48 = arith.constant 48 : index
    %337 = memref.load %arg2[%c48] : memref<93xf32, #tpu.memory_space<smem>>
    %338 = vector.broadcast %337 : f32 to vector<8x128xf32>
    %339 = arith.mulf %336, %338 : vector<8x128xf32>
    %340 = arith.addf %334, %339 : vector<8x128xf32>
    %c4_161 = arith.constant 4 : index
    %c0_162 = arith.constant 0 : index
    %c0_163 = arith.constant 0 : index
    %341 = vector.load %arg1[%c4_161, %c0_162, %c0_163] : memref<9x8x128xf32, #tpu.memory_space<vmem>>, vector<1x8x128xf32>
    %342 = vector.shape_cast %341 : vector<1x8x128xf32> to vector<8x128xf32>
    %c49 = arith.constant 49 : index
    %343 = memref.load %arg2[%c49] : memref<93xf32, #tpu.memory_space<smem>>
    %344 = vector.broadcast %343 : f32 to vector<8x128xf32>
    %345 = arith.mulf %342, %344 : vector<8x128xf32>
    %346 = arith.addf %340, %345 : vector<8x128xf32>
    %c5_164 = arith.constant 5 : index
    %c0_165 = arith.constant 0 : index
    %c0_166 = arith.constant 0 : index
    %347 = vector.load %arg1[%c5_164, %c0_165, %c0_166] : memref<9x8x128xf32, #tpu.memory_space<vmem>>, vector<1x8x128xf32>
    %348 = vector.shape_cast %347 : vector<1x8x128xf32> to vector<8x128xf32>
    %c50 = arith.constant 50 : index
    %349 = memref.load %arg2[%c50] : memref<93xf32, #tpu.memory_space<smem>>
    %350 = vector.broadcast %349 : f32 to vector<8x128xf32>
    %351 = arith.mulf %348, %350 : vector<8x128xf32>
    %352 = arith.addf %346, %351 : vector<8x128xf32>
    %c6_167 = arith.constant 6 : index
    %c0_168 = arith.constant 0 : index
    %c0_169 = arith.constant 0 : index
    %353 = vector.load %arg1[%c6_167, %c0_168, %c0_169] : memref<9x8x128xf32, #tpu.memory_space<vmem>>, vector<1x8x128xf32>
    %354 = vector.shape_cast %353 : vector<1x8x128xf32> to vector<8x128xf32>
    %c51 = arith.constant 51 : index
    %355 = memref.load %arg2[%c51] : memref<93xf32, #tpu.memory_space<smem>>
    %356 = vector.broadcast %355 : f32 to vector<8x128xf32>
    %357 = arith.mulf %354, %356 : vector<8x128xf32>
    %358 = arith.addf %352, %357 : vector<8x128xf32>
    %c7_170 = arith.constant 7 : index
    %c0_171 = arith.constant 0 : index
    %c0_172 = arith.constant 0 : index
    %359 = vector.load %arg1[%c7_170, %c0_171, %c0_172] : memref<9x8x128xf32, #tpu.memory_space<vmem>>, vector<1x8x128xf32>
    %360 = vector.shape_cast %359 : vector<1x8x128xf32> to vector<8x128xf32>
    %c52 = arith.constant 52 : index
    %361 = memref.load %arg2[%c52] : memref<93xf32, #tpu.memory_space<smem>>
    %362 = vector.broadcast %361 : f32 to vector<8x128xf32>
    %363 = arith.mulf %360, %362 : vector<8x128xf32>
    %364 = arith.addf %358, %363 : vector<8x128xf32>
    %c8_173 = arith.constant 8 : index
    %c0_174 = arith.constant 0 : index
    %c0_175 = arith.constant 0 : index
    %365 = vector.load %arg1[%c8_173, %c0_174, %c0_175] : memref<9x8x128xf32, #tpu.memory_space<vmem>>, vector<1x8x128xf32>
    %366 = vector.shape_cast %365 : vector<1x8x128xf32> to vector<8x128xf32>
    %c53 = arith.constant 53 : index
    %367 = memref.load %arg2[%c53] : memref<93xf32, #tpu.memory_space<smem>>
    %368 = vector.broadcast %367 : f32 to vector<8x128xf32>
    %369 = arith.mulf %366, %368 : vector<8x128xf32>
    %370 = arith.addf %364, %369 : vector<8x128xf32>
    %cst_176 = arith.constant 5.000000e-01 : f32
    %371 = vector.broadcast %cst_176 : f32 to vector<8x128xf32>
    %372 = arith.mulf %371, %370 : vector<8x128xf32>
    %373 = math.tanh %372 : vector<8x128xf32>
    %cst_177 = arith.constant 5.000000e-01 : f32
    %374 = vector.broadcast %cst_177 : f32 to vector<8x128xf32>
    %375 = arith.mulf %374, %373 : vector<8x128xf32>
    %cst_178 = arith.constant 5.000000e-01 : f32
    %376 = vector.broadcast %cst_178 : f32 to vector<8x128xf32>
    %377 = arith.addf %375, %376 : vector<8x128xf32>
    %c60 = arith.constant 60 : index
    %378 = memref.load %arg2[%c60] : memref<93xf32, #tpu.memory_space<smem>>
    %379 = vector.broadcast %378 : f32 to vector<8x128xf32>
    %380 = arith.mulf %62, %379 : vector<8x128xf32>
    %c84 = arith.constant 84 : index
    %381 = memref.load %arg2[%c84] : memref<93xf32, #tpu.memory_space<smem>>
    %382 = vector.broadcast %381 : f32 to vector<8x128xf32>
    %383 = arith.addf %380, %382 : vector<8x128xf32>
    %c61 = arith.constant 61 : index
    %384 = memref.load %arg2[%c61] : memref<93xf32, #tpu.memory_space<smem>>
    %385 = vector.broadcast %384 : f32 to vector<8x128xf32>
    %386 = arith.mulf %125, %385 : vector<8x128xf32>
    %387 = arith.addf %383, %386 : vector<8x128xf32>
    %c62 = arith.constant 62 : index
    %388 = memref.load %arg2[%c62] : memref<93xf32, #tpu.memory_space<smem>>
    %389 = vector.broadcast %388 : f32 to vector<8x128xf32>
    %390 = arith.mulf %188, %389 : vector<8x128xf32>
    %391 = arith.addf %387, %390 : vector<8x128xf32>
    %c63 = arith.constant 63 : index
    %392 = memref.load %arg2[%c63] : memref<93xf32, #tpu.memory_space<smem>>
    %393 = vector.broadcast %392 : f32 to vector<8x128xf32>
    %394 = arith.mulf %251, %393 : vector<8x128xf32>
    %395 = arith.addf %391, %394 : vector<8x128xf32>
    %c64 = arith.constant 64 : index
    %396 = memref.load %arg2[%c64] : memref<93xf32, #tpu.memory_space<smem>>
    %397 = vector.broadcast %396 : f32 to vector<8x128xf32>
    %398 = arith.mulf %314, %397 : vector<8x128xf32>
    %399 = arith.addf %395, %398 : vector<8x128xf32>
    %c65 = arith.constant 65 : index
    %400 = memref.load %arg2[%c65] : memref<93xf32, #tpu.memory_space<smem>>
    %401 = vector.broadcast %400 : f32 to vector<8x128xf32>
    %402 = arith.mulf %377, %401 : vector<8x128xf32>
    %403 = arith.addf %399, %402 : vector<8x128xf32>
    %cst_179 = arith.constant 5.000000e-01 : f32
    %404 = vector.broadcast %cst_179 : f32 to vector<8x128xf32>
    %405 = arith.mulf %404, %403 : vector<8x128xf32>
    %406 = math.tanh %405 : vector<8x128xf32>
    %cst_180 = arith.constant 5.000000e-01 : f32
    %407 = vector.broadcast %cst_180 : f32 to vector<8x128xf32>
    %408 = arith.mulf %407, %406 : vector<8x128xf32>
    %cst_181 = arith.constant 5.000000e-01 : f32
    %409 = vector.broadcast %cst_181 : f32 to vector<8x128xf32>
    %410 = arith.addf %408, %409 : vector<8x128xf32>
    %c66 = arith.constant 66 : index
    %411 = memref.load %arg2[%c66] : memref<93xf32, #tpu.memory_space<smem>>
    %412 = vector.broadcast %411 : f32 to vector<8x128xf32>
    %413 = arith.mulf %62, %412 : vector<8x128xf32>
    %c85 = arith.constant 85 : index
    %414 = memref.load %arg2[%c85] : memref<93xf32, #tpu.memory_space<smem>>
    %415 = vector.broadcast %414 : f32 to vector<8x128xf32>
    %416 = arith.addf %413, %415 : vector<8x128xf32>
    %c67 = arith.constant 67 : index
    %417 = memref.load %arg2[%c67] : memref<93xf32, #tpu.memory_space<smem>>
    %418 = vector.broadcast %417 : f32 to vector<8x128xf32>
    %419 = arith.mulf %125, %418 : vector<8x128xf32>
    %420 = arith.addf %416, %419 : vector<8x128xf32>
    %c68 = arith.constant 68 : index
    %421 = memref.load %arg2[%c68] : memref<93xf32, #tpu.memory_space<smem>>
    %422 = vector.broadcast %421 : f32 to vector<8x128xf32>
    %423 = arith.mulf %188, %422 : vector<8x128xf32>
    %424 = arith.addf %420, %423 : vector<8x128xf32>
    %c69 = arith.constant 69 : index
    %425 = memref.load %arg2[%c69] : memref<93xf32, #tpu.memory_space<smem>>
    %426 = vector.broadcast %425 : f32 to vector<8x128xf32>
    %427 = arith.mulf %251, %426 : vector<8x128xf32>
    %428 = arith.addf %424, %427 : vector<8x128xf32>
    %c70 = arith.constant 70 : index
    %429 = memref.load %arg2[%c70] : memref<93xf32, #tpu.memory_space<smem>>
    %430 = vector.broadcast %429 : f32 to vector<8x128xf32>
    %431 = arith.mulf %314, %430 : vector<8x128xf32>
    %432 = arith.addf %428, %431 : vector<8x128xf32>
    %c71 = arith.constant 71 : index
    %433 = memref.load %arg2[%c71] : memref<93xf32, #tpu.memory_space<smem>>
    %434 = vector.broadcast %433 : f32 to vector<8x128xf32>
    %435 = arith.mulf %377, %434 : vector<8x128xf32>
    %436 = arith.addf %432, %435 : vector<8x128xf32>
    %cst_182 = arith.constant 5.000000e-01 : f32
    %437 = vector.broadcast %cst_182 : f32 to vector<8x128xf32>
    %438 = arith.mulf %437, %436 : vector<8x128xf32>
    %439 = math.tanh %438 : vector<8x128xf32>
    %cst_183 = arith.constant 5.000000e-01 : f32
    %440 = vector.broadcast %cst_183 : f32 to vector<8x128xf32>
    %441 = arith.mulf %440, %439 : vector<8x128xf32>
    %cst_184 = arith.constant 5.000000e-01 : f32
    %442 = vector.broadcast %cst_184 : f32 to vector<8x128xf32>
    %443 = arith.addf %441, %442 : vector<8x128xf32>
    %c72 = arith.constant 72 : index
    %444 = memref.load %arg2[%c72] : memref<93xf32, #tpu.memory_space<smem>>
    %445 = vector.broadcast %444 : f32 to vector<8x128xf32>
    %446 = arith.mulf %62, %445 : vector<8x128xf32>
    %c86 = arith.constant 86 : index
    %447 = memref.load %arg2[%c86] : memref<93xf32, #tpu.memory_space<smem>>
    %448 = vector.broadcast %447 : f32 to vector<8x128xf32>
    %449 = arith.addf %446, %448 : vector<8x128xf32>
    %c73 = arith.constant 73 : index
    %450 = memref.load %arg2[%c73] : memref<93xf32, #tpu.memory_space<smem>>
    %451 = vector.broadcast %450 : f32 to vector<8x128xf32>
    %452 = arith.mulf %125, %451 : vector<8x128xf32>
    %453 = arith.addf %449, %452 : vector<8x128xf32>
    %c74 = arith.constant 74 : index
    %454 = memref.load %arg2[%c74] : memref<93xf32, #tpu.memory_space<smem>>
    %455 = vector.broadcast %454 : f32 to vector<8x128xf32>
    %456 = arith.mulf %188, %455 : vector<8x128xf32>
    %457 = arith.addf %453, %456 : vector<8x128xf32>
    %c75 = arith.constant 75 : index
    %458 = memref.load %arg2[%c75] : memref<93xf32, #tpu.memory_space<smem>>
    %459 = vector.broadcast %458 : f32 to vector<8x128xf32>
    %460 = arith.mulf %251, %459 : vector<8x128xf32>
    %461 = arith.addf %457, %460 : vector<8x128xf32>
    %c76 = arith.constant 76 : index
    %462 = memref.load %arg2[%c76] : memref<93xf32, #tpu.memory_space<smem>>
    %463 = vector.broadcast %462 : f32 to vector<8x128xf32>
    %464 = arith.mulf %314, %463 : vector<8x128xf32>
    %465 = arith.addf %461, %464 : vector<8x128xf32>
    %c77 = arith.constant 77 : index
    %466 = memref.load %arg2[%c77] : memref<93xf32, #tpu.memory_space<smem>>
    %467 = vector.broadcast %466 : f32 to vector<8x128xf32>
    %468 = arith.mulf %377, %467 : vector<8x128xf32>
    %469 = arith.addf %465, %468 : vector<8x128xf32>
    %cst_185 = arith.constant 5.000000e-01 : f32
    %470 = vector.broadcast %cst_185 : f32 to vector<8x128xf32>
    %471 = arith.mulf %470, %469 : vector<8x128xf32>
    %472 = math.tanh %471 : vector<8x128xf32>
    %cst_186 = arith.constant 5.000000e-01 : f32
    %473 = vector.broadcast %cst_186 : f32 to vector<8x128xf32>
    %474 = arith.mulf %473, %472 : vector<8x128xf32>
    %cst_187 = arith.constant 5.000000e-01 : f32
    %475 = vector.broadcast %cst_187 : f32 to vector<8x128xf32>
    %476 = arith.addf %474, %475 : vector<8x128xf32>
    %c78 = arith.constant 78 : index
    %477 = memref.load %arg2[%c78] : memref<93xf32, #tpu.memory_space<smem>>
    %478 = vector.broadcast %477 : f32 to vector<8x128xf32>
    %479 = arith.mulf %62, %478 : vector<8x128xf32>
    %c87 = arith.constant 87 : index
    %480 = memref.load %arg2[%c87] : memref<93xf32, #tpu.memory_space<smem>>
    %481 = vector.broadcast %480 : f32 to vector<8x128xf32>
    %482 = arith.addf %479, %481 : vector<8x128xf32>
    %c79 = arith.constant 79 : index
    %483 = memref.load %arg2[%c79] : memref<93xf32, #tpu.memory_space<smem>>
    %484 = vector.broadcast %483 : f32 to vector<8x128xf32>
    %485 = arith.mulf %125, %484 : vector<8x128xf32>
    %486 = arith.addf %482, %485 : vector<8x128xf32>
    %c80 = arith.constant 80 : index
    %487 = memref.load %arg2[%c80] : memref<93xf32, #tpu.memory_space<smem>>
    %488 = vector.broadcast %487 : f32 to vector<8x128xf32>
    %489 = arith.mulf %188, %488 : vector<8x128xf32>
    %490 = arith.addf %486, %489 : vector<8x128xf32>
    %c81 = arith.constant 81 : index
    %491 = memref.load %arg2[%c81] : memref<93xf32, #tpu.memory_space<smem>>
    %492 = vector.broadcast %491 : f32 to vector<8x128xf32>
    %493 = arith.mulf %251, %492 : vector<8x128xf32>
    %494 = arith.addf %490, %493 : vector<8x128xf32>
    %c82 = arith.constant 82 : index
    %495 = memref.load %arg2[%c82] : memref<93xf32, #tpu.memory_space<smem>>
    %496 = vector.broadcast %495 : f32 to vector<8x128xf32>
    %497 = arith.mulf %314, %496 : vector<8x128xf32>
    %498 = arith.addf %494, %497 : vector<8x128xf32>
    %c83 = arith.constant 83 : index
    %499 = memref.load %arg2[%c83] : memref<93xf32, #tpu.memory_space<smem>>
    %500 = vector.broadcast %499 : f32 to vector<8x128xf32>
    %501 = arith.mulf %377, %500 : vector<8x128xf32>
    %502 = arith.addf %498, %501 : vector<8x128xf32>
    %cst_188 = arith.constant 5.000000e-01 : f32
    %503 = vector.broadcast %cst_188 : f32 to vector<8x128xf32>
    %504 = arith.mulf %503, %502 : vector<8x128xf32>
    %505 = math.tanh %504 : vector<8x128xf32>
    %cst_189 = arith.constant 5.000000e-01 : f32
    %506 = vector.broadcast %cst_189 : f32 to vector<8x128xf32>
    %507 = arith.mulf %506, %505 : vector<8x128xf32>
    %cst_190 = arith.constant 5.000000e-01 : f32
    %508 = vector.broadcast %cst_190 : f32 to vector<8x128xf32>
    %509 = arith.addf %507, %508 : vector<8x128xf32>
    %c88 = arith.constant 88 : index
    %510 = memref.load %arg2[%c88] : memref<93xf32, #tpu.memory_space<smem>>
    %511 = vector.broadcast %510 : f32 to vector<8x128xf32>
    %512 = arith.mulf %410, %511 : vector<8x128xf32>
    %c92 = arith.constant 92 : index
    %513 = memref.load %arg2[%c92] : memref<93xf32, #tpu.memory_space<smem>>
    %514 = vector.broadcast %513 : f32 to vector<8x128xf32>
    %515 = arith.addf %512, %514 : vector<8x128xf32>
    %c89 = arith.constant 89 : index
    %516 = memref.load %arg2[%c89] : memref<93xf32, #tpu.memory_space<smem>>
    %517 = vector.broadcast %516 : f32 to vector<8x128xf32>
    %518 = arith.mulf %443, %517 : vector<8x128xf32>
    %519 = arith.addf %515, %518 : vector<8x128xf32>
    %c90 = arith.constant 90 : index
    %520 = memref.load %arg2[%c90] : memref<93xf32, #tpu.memory_space<smem>>
    %521 = vector.broadcast %520 : f32 to vector<8x128xf32>
    %522 = arith.mulf %476, %521 : vector<8x128xf32>
    %523 = arith.addf %519, %522 : vector<8x128xf32>
    %c91 = arith.constant 91 : index
    %524 = memref.load %arg2[%c91] : memref<93xf32, #tpu.memory_space<smem>>
    %525 = vector.broadcast %524 : f32 to vector<8x128xf32>
    %526 = arith.mulf %509, %525 : vector<8x128xf32>
    %527 = arith.addf %523, %526 : vector<8x128xf32>
    %cst_191 = arith.constant 5.000000e-01 : f32
    %528 = vector.broadcast %cst_191 : f32 to vector<8x128xf32>
    %529 = arith.mulf %528, %527 : vector<8x128xf32>
    %530 = math.tanh %529 : vector<8x128xf32>
    %cst_192 = arith.constant 5.000000e-01 : f32
    %531 = vector.broadcast %cst_192 : f32 to vector<8x128xf32>
    %532 = arith.mulf %531, %530 : vector<8x128xf32>
    %cst_193 = arith.constant 5.000000e-01 : f32
    %533 = vector.broadcast %cst_193 : f32 to vector<8x128xf32>
    %534 = arith.addf %532, %533 : vector<8x128xf32>
    %c0_194 = arith.constant 0 : index
    %c0_195 = arith.constant 0 : index
    %535 = vector.load %arg3[%c0_194, %c0_195] : memref<8x128xf32, #tpu.memory_space<vmem>>, vector<8x128xf32>
    tpu.vector_store %arg3[%c0_194, %c0_195], %534 {strides = array<i32>} : memref<8x128xf32, #tpu.memory_space<vmem>>, vector<8x128xf32>,
    return
  }
  func.func @transform_0(%arg0: i32) -> (i32, i32, i32) {
    %c0_i32 = arith.constant 0 : i32
    %c0_i32_0 = arith.constant 0 : i32
    %c0_i32_1 = arith.constant 0 : i32
    return %c0_i32, %c0_i32_0, %arg0 : i32, i32, i32
  }
  func.func @transform_1(%arg0: i32) -> i32 {
    %c0_i32 = arith.constant 0 : i32
    %c0_i32_0 = arith.constant 0 : i32
    return %c0_i32 : i32
  }
  func.func @transform_2(%arg0: i32) -> (i32, i32) {
    %c0_i32 = arith.constant 0 : i32
    %c0_i32_0 = arith.constant 0 : i32
    return %c0_i32, %arg0 : i32, i32
  }
}

</mosaic_0001>

<bundles_post_ra>
// kernel: mymodule_forward.1
= control target key start
LH: loop header
LB: loop body
LE: loop exit
PB: predicated region body
PF: predicated region fallthrough
CT: control target
= control target key end

     0   :  { %7 = vsyncpa [#allocation3], 0  ;;  %s891_s0 = inlined_call_operand.vmem [shape: f32[9,8,128], index: 0, kind: input, shape index: {}]   ;;  %s892_s1 = inlined_call_operand.vmem [shape: f32[93], index: 1, kind: input, shape index: {}]   ;;  %s893_s2 = inlined_call_operand.vmem [shape: f32[8,128], index: 2, kind: output, shape index: {}]  }
   0x1   :  { %s16_s11 = sshll.u32 %s892_s1, 4  ;;  %s17_s11 = int_to_ptr.vmem [resolvable:$true] %s16_s11 }
   0x2   :  { %s564_s12 = scalar_lea.vmem %s17_s11, 16  ;;  %p569_p1 = scmp.lt.s32.totalorder %s17_s11, %s17_s11 }
   0x3   :  { %p565_p0 = scmp.ne.s32.totalorder %s17_s11, %s564_s12  ;;  %p570_p2 = scmp.lt.s32.totalorder %s564_s12, %s564_s12 }
   0x5   :  { %p571_p3 = por %p570_p2, %p569_p1 }
   0x7   :  { %p572_p4 = pnand %p571_p3, %p565_p0 }
   0x9   :  { %575 = shalt.err (!%p572_p4)
}
   0xa   :  { %s578_s13 = smov [#allocation2]  }
   0xb   :  { %19 = dma.vmem_to_smem %s17_s11, 16, %s578_s13, [#allocation3]  }
   0xc   :  { %576 = dma.done.wait [#allocation3], 16  }
   0xd   :  { %577 = vsyncadd [#allocation3], 4294967280 }
   0xe   :  { %23 = sfence }
   0xf   :  { %s25_s14 = sld [smem:[#allocation2]]  ;;  %v600_v0 = vld [vmem:[%s891_s0] sm:$0xff]  ;;  %v605_v2 = vld [vmem:[%s891_s0 + $0x8] sm:$0xff]  ;;  %v613_v5 = vld [vmem:[%s891_s0 + $0x10] sm:$0xff] }
  0x10   :  { %s441_s15 = sld [smem:[#allocation2 + $0x36]]  ;;  %v626_v11 = vld [vmem:[%s891_s0 + $0x18] sm:$0xff]  ;;  %v632_v16 = vld [vmem:[%s891_s0 + $0x20] sm:$0xff]  ;;  %v640_v21 = vld [vmem:[%s891_s0 + $0x28] sm:$0xff] }
  0x11   :  { %s443_s16 = sld [smem:[#allocation2 + $0x1]]  ;;  %v657_v36 = vld [vmem:[%s891_s0 + $0x30] sm:$0xff]  ;;  %v670_v43 = vld [vmem:[%s891_s0 + $0x38] sm:$0xff]  ;;  %v696_v62 = vld [vmem:[%s891_s0 + $0x40] sm:$0xff] }
  0x12   :  { %s445_s17 = sld [smem:[#allocation2 + $0x2]] }
  0x13   :  { %s447_s1 = sld [smem:[#allocation2 + $0x3]] }
  0x14   :  { %s449_s20 = sld [smem:[#allocation2 + $0x4]] }
  0x15   :  { %v26_v1 = vstv %s25_s14  ;;  %s607_s23 = sld [smem:[#allocation2 + $0x5]] }
  0x16   :  { %v27_v3 = vmul.f32 %v26_v1, %v600_v0  ;;  %v29_v4 = vstv %s441_s15  ;;  %s615_s26 = sld [smem:[#allocation2 + $0x6]] }
  0x17   :  { %v34_v6 = vstv %s443_s16  ;;  %s617_s27 = sld [smem:[#allocation2 + $0x7]] }
  0x18   :  { %v30_v7 = vadd.f32 %v29_v4, %v27_v3  ;;  %v35_v8 = vmul.f32 %v605_v2, %v34_v6  ;;  %v40_v9 = vstv %s445_s17  ;;  %s620_s28 = sld [smem:[#allocation2 + $0x8]] }
  0x19   :  { %v41_v10 = vmul.f32 %v613_v5, %v40_v9  ;;  %v46_v12 = vstv %s447_s1  ;;  %s458_s3 = sld [smem:[#allocation2 + $0x9]] }
  0x1a   :  { %v36_v13 = vadd.f32 %v35_v8, %v30_v7  ;;  %s459_s4 = sld [smem:[#allocation2 + $0x37]]  ;;  %v47_v15 = vmul.f32 %v626_v11, %v46_v12  ;;  %v52_v17 = vstv %s449_s20 }
  0x1b   :  { %s460_s5 = sld [smem:[#allocation2 + $0xa]]  ;;  %v53_v18 = vmul.f32 %v632_v16, %v52_v17  ;;  %v58_v22 = vstv %s607_s23 }
  0x1c   :  { %v42_v14 = vadd.f32 %v41_v10, %v36_v13  ;;  %s461_s8 = sld [smem:[#allocation2 + $0xb]]  ;;  %v59_v29 = vmul.f32 %v640_v21, %v58_v22  ;;  %v64_v37 = vstv %s615_s26 }
  0x1d   :  { %s462_s9 = sld [smem:[#allocation2 + $0xc]]  ;;  %v65_v42 = vmul.f32 %v657_v36, %v64_v37  ;;  %v70_v44 = vstv %s617_s27 }
  0x1e   :  { %s463_s10 = sld [smem:[#allocation2 + $0xd]]  ;;  %v48_v20 = vadd.f32 %v47_v15, %v42_v14  ;;  %v71_v52 = vmul.f32 %v670_v43, %v70_v44  ;;  %v76_v55 = vstv %s620_s28 }
  0x1f   :  { %v84_v19 = vstv %s458_s3  ;;  %s635_s11 = sld [smem:[#allocation2 + $0xe]]  ;;  %v77_v12 = vmul.f32 %v696_v62, %v76_v55 }
  0x20   :  { %v85_v23 = vmul.f32 %v84_v19, %v600_v0  ;;  %v87_v24 = vstv %s459_s4  ;;  %s644_s14 = sld [smem:[#allocation2 + $0xf]]  ;;  %v54_v32 = vadd.f32 %v53_v18, %v48_v20 }
  0x21   :  { %v90_v25 = vstv %s460_s5  ;;  %s646_s15 = sld [smem:[#allocation2 + $0x10]] }
  0x22   :  { %v88_v26 = vadd.f32 %v87_v24, %v85_v23  ;;  %v91_v27 = vmul.f32 %v605_v2, %v90_v25  ;;  %v94_v28 = vstv %s461_s8  ;;  %s649_s16 = sld [smem:[#allocation2 + $0x11]]  ;;  %v60_v41 = vadd.f32 %v59_v29, %v54_v32 }
  0x23   :  { %v95_v30 = vmul.f32 %v613_v5, %v94_v28  ;;  %v98_v31 = vstv %s462_s9  ;;  %s468_s17 = sld [smem:[#allocation2 + $0x12]] }
  0x24   :  { %v92_v33 = vadd.f32 %v91_v27, %v88_v26  ;;  %v99_v34 = vmul.f32 %v626_v11, %v98_v31  ;;  %v102_v35 = vstv %s463_s10  ;;  %s469_s18 = sld [smem:[#allocation2 + $0x38]]  ;;  %v66_v54 = vadd.f32 %v65_v42, %v60_v41 }
  0x25   :  { %s470_s20 = sld [smem:[#allocation2 + $0x13]]  ;;  %v103_v39 = vmul.f32 %v632_v16, %v102_v35  ;;  %v106_v40 = vstv %s635_s11 }
  0x26   :  { %v96_v38 = vadd.f32 %v95_v30, %v92_v33  ;;  %s662_s21 = sld [smem:[#allocation2 + $0x14]]  ;;  %v107_v46 = vmul.f32 %v640_v21, %v106_v40  ;;  %v110_v49 = vstv %s644_s14  ;;  %v72_v10 = vadd.f32 %v71_v52, %v66_v54 }
  0x27   :  { %s664_s22 = sld [smem:[#allocation2 + $0x15]]  ;;  %v111_v58 = vmul.f32 %v657_v36, %v110_v49  ;;  %v114_v59 = vstv %s646_s15 }
  0x28   :  { %v100_v45 = vadd.f32 %v99_v34, %v96_v38  ;;  %s673_s25 = sld [smem:[#allocation2 + $0x16]]  ;;  %v115_v13 = vmul.f32 %v670_v43, %v114_v59  ;;  %v118_v17 = vstv %s649_s16  ;;  %v78_v26 = vadd.f32 %v77_v12, %v72_v10 }
  0x29   :  { %v126_v47 = vstv %s468_s17  ;;  %s676_s26 = sld [smem:[#allocation2 + $0x17]]  ;;  %v119_v27 = vmul.f32 %v696_v62, %v118_v17 }
  0x2a   :  { %v104_v48 = vadd.f32 %v103_v39, %v100_v45  ;;  %v127_v50 = vmul.f32 %v126_v47, %v600_v0  ;;  %v129_v51 = vstv %s469_s18  ;;  %s680_s29 = sld [smem:[#allocation2 + $0x18]]  ;;  %v79_v44 = vmul.f32 0.5, %v78_v26 }
  0x2b   :  { %v132_v53 = vstv %s470_s20  ;;  %s683_s27 = sld [smem:[#allocation2 + $0x19]] }
  0x2c   :  { %v130_v56 = vadd.f32 %v129_v51, %v127_v50  ;;  %v133_v57 = vmul.f32 %v605_v2, %v132_v53  ;;  %s687_s30 = sld [smem:[#allocation2 + $0x1a]]  ;;  %v136_v60 = vstv %s662_s21  ;;  %v108_v63 = vadd.f32 %v107_v46, %v104_v48 }
  0x2d   :  { %v140_v61 = vstv %s664_s22  ;;  %s478_s3 = sld [smem:[#allocation2 + $0x1b]]  ;;  %v137_v3 = vmul.f32 %v613_v5, %v136_v60  ;;  %542 = vtanh.f32 %v79_v44 }
  0x2e   :  { %v134_v1 = vadd.f32 %v133_v57, %v130_v56  ;;  %v141_v4 = vmul.f32 %v626_v11, %v140_v61  ;;  %s700_s28 = sld [smem:[#allocation2 + $0x39]]  ;;  %v144_v6 = vstv %s673_s25  ;;  %v112_v15 = vadd.f32 %v111_v58, %v108_v63 }
  0x2f   :  { %v148_v7 = vstv %s676_s26  ;;  %s480_s6 = sld [smem:[#allocation2 + $0x1c]]  ;;  %v145_v9 = vmul.f32 %v632_v16, %v144_v6 }
  0x30   :  { %v138_v8 = vadd.f32 %v137_v3, %v134_v1  ;;  %s705_s7 = sld [smem:[#allocation2 + $0x1d]]  ;;  %v152_v14 = vstv %s680_s29  ;;  %v149_v19 = vmul.f32 %v640_v21, %v148_v7  ;;  %v116_v30 = vadd.f32 %v115_v13, %v112_v15 }
  0x31   :  { %s710_s0 = sld [smem:[#allocation2 + $0x1e]]  ;;  %v153_v23 = vmul.f32 %v657_v36, %v152_v14  ;;  %v156_v24 = vstv %s683_s27 }
  0x32   :  { %v142_v18 = vadd.f32 %v141_v4, %v138_v8  ;;  %s714_s8 = sld [smem:[#allocation2 + $0x1f]]  ;;  %v157_v34 = vmul.f32 %v670_v43, %v156_v24  ;;  %v160_v35 = vstv %s687_s30  ;;  %v120_v49 = vadd.f32 %v119_v27, %v116_v30 }
  0x33   :  { %v168_v20 = vstv %s478_s3  ;;  %s716_s9 = sld [smem:[#allocation2 + $0x20]]  ;;  %v161_v51 = vmul.f32 %v696_v62, %v160_v35 }
  0x34   :  { %v146_v22 = vadd.f32 %v145_v9, %v142_v18  ;;  %v169_v25 = vmul.f32 %v168_v20, %v600_v0  ;;  %s721_s10 = sld [smem:[#allocation2 + $0x21]]  ;;  %v171_v28 = vstv %s700_s28  ;;  %v121_v61 = vmul.f32 0.5, %v120_v49 }
  0x35   :  { %v174_v29 = vstv %s480_s6  ;;  %s725_s11 = sld [smem:[#allocation2 + $0x22]] }
  0x36   :  { %v150_v31 = vadd.f32 %v149_v19, %v146_v22  ;;  %v172_v32 = vadd.f32 %v171_v28, %v169_v25  ;;  %v175_v33 = vmul.f32 %v605_v2, %v174_v29  ;;  %s728_s12 = sld [smem:[#allocation2 + $0x23]]  ;;  %v178_v37 = vstv %s705_s7 }
  0x37   :  { %v182_v38 = vstv %s710_s0  ;;  %s488_s13 = sld [smem:[#allocation2 + $0x24]]  ;;  %v179_v41 = vmul.f32 %v613_v5, %v178_v37  ;;  %544 = vtanh.f32 %v121_v61 }
  0x38   :  { %v154_v39 = vadd.f32 %v153_v23, %v150_v31  ;;  %v176_v40 = vadd.f32 %v175_v33, %v172_v32  ;;  %v183_v42 = vmul.f32 %v626_v11, %v182_v38  ;;  %s736_s14 = sld [smem:[#allocation2 + $0x3a]]  ;;  %v186_v45 = vstv %s714_s8 }
  0x39   :  { %v190_v46 = vstv %s716_s9  ;;  %s490_s15 = sld [smem:[#allocation2 + $0x25]]  ;;  %v187_v48 = vmul.f32 %v632_v16, %v186_v45 }
  0x3a   :  { %v180_v47 = vadd.f32 %v179_v41, %v176_v40  ;;  %s741_s16 = sld [smem:[#allocation2 + $0x26]]  ;;  %v158_v50 = vadd.f32 %v157_v34, %v154_v39  ;;  %v194_v52 = vstv %s721_s10  ;;  %v191_v54 = vmul.f32 %v640_v21, %v190_v46  ;;  %v543_v39 = vpop.eup %542 }
  0x3b   :  { %s492_s17 = sld [smem:[#allocation2 + $0x27]]  ;;  %v198_v55 = vstv %s725_s11  ;;  %v195_v58 = vmul.f32 %v657_v36, %v194_v52 }
  0x3c   :  { %v184_v53 = vadd.f32 %v183_v42, %v180_v47  ;;  %s746_s18 = sld [smem:[#allocation2 + $0x28]]  ;;  %v202_v59 = vstv %s728_s12  ;;  %v162_v63 = vadd.f32 %v161_v51, %v158_v50  ;;  %v199_v6 = vmul.f32 %v670_v43, %v198_v55 }
  0x3d   :  { %v210_v56 = vstv %s488_s13  ;;  %s749_s19 = sld [smem:[#allocation2 + $0x29]]  ;;  %v203_v9 = vmul.f32 %v696_v62, %v202_v59  ;;  %v81_v55 = vmul.f32 0.5, %v543_v39 }
  0x3e   :  { %v188_v57 = vadd.f32 %v187_v48, %v184_v53  ;;  %v211_v60 = vmul.f32 %v210_v56, %v600_v0  ;;  %s754_s1 = sld [smem:[#allocation2 + $0x2a]]  ;;  %v213_v1 = vstv %s736_s14  ;;  %v163_v18 = vmul.f32 0.5, %v162_v63 }
  0x3f   :  { %v216_v3 = vstv %s490_s15  ;;  %s757_s20 = sld [smem:[#allocation2 + $0x2b]]  ;;  %v821_v63 = vadd.f32 0.5, %v81_v55 }
  0x40   :  { %v192_v4 = vadd.f32 %v191_v54, %v188_v57  ;;  %v214_v7 = vadd.f32 %v213_v1, %v211_v60  ;;  %v217_v8 = vmul.f32 %v605_v2, %v216_v3  ;;  %s761_s21 = sld [smem:[#allocation2 + $0x2c]]  ;;  %v220_v10 = vstv %s741_s16 }
  0x41   :  { %v224_v12 = vstv %s492_s17  ;;  %s498_s22 = sld [smem:[#allocation2 + $0x2d]]  ;;  %v221_v15 = vmul.f32 %v613_v5, %v220_v10  ;;  %546 = vtanh.f32 %v163_v18 }
  0x42   :  { %v196_v13 = vadd.f32 %v195_v58, %v192_v4  ;;  %v218_v14 = vadd.f32 %v217_v8, %v214_v7  ;;  %v225_v17 = vmul.f32 %v626_v11, %v224_v12  ;;  %s767_s23 = sld [smem:[#allocation2 + $0x3b]]  ;;  %v228_v19 = vstv %s746_s18 }
  0x43   :  { %v232_v20 = vstv %s749_s19  ;;  %s500_s24 = sld [smem:[#allocation2 + $0x2e]]  ;;  %v229_v24 = vmul.f32 %v632_v16, %v228_v19 }
  0x44   :  { %v200_v22 = vadd.f32 %v199_v6, %v196_v13  ;;  %v222_v23 = vadd.f32 %v221_v15, %v218_v14  ;;  %s772_s25 = sld [smem:[#allocation2 + $0x2f]]  ;;  %v236_v25 = vstv %s754_s1  ;;  %v233_v28 = vmul.f32 %v640_v21, %v232_v20 }
  0x45   :  { %s775_s26 = sld [smem:[#allocation2 + $0x30]]  ;;  %v237_v29 = vmul.f32 %v657_v36, %v236_v25  ;;  %v240_v30 = vstv %s757_s20 }
  0x46   :  { %v204_v26 = vadd.f32 %v203_v9, %v200_v22  ;;  %v226_v27 = vadd.f32 %v225_v17, %v222_v23  ;;  %s778_s29 = sld [smem:[#allocation2 + $0x31]]  ;;  %v244_v34 = vstv %s761_s21  ;;  %v241_v41 = vmul.f32 %v670_v43, %v240_v30 }
  0x47   :  { %v252_v31 = vstv %s498_s22  ;;  %s782_s27 = sld [smem:[#allocation2 + $0x32]] }
  0x48   :  { %v205_v32 = vmul.f32 0.5, %v204_v26  ;;  %v230_v33 = vadd.f32 %v229_v24, %v226_v27  ;;  %v253_v35 = vmul.f32 %v252_v31, %v600_v0  ;;  %s786_s30 = sld [smem:[#allocation2 + $0x33]]  ;;  %v255_v37 = vstv %s767_s23 }
  0x49   :  { %v258_v38 = vstv %s500_s24  ;;  %s789_s3 = sld [smem:[#allocation2 + $0x34]]  ;;  %v245_v0 = vmul.f32 %v696_v62, %v244_v34 }
  0x4a   :  { %v234_v40 = vadd.f32 %v233_v28, %v230_v33  ;;  %v256_v42 = vadd.f32 %v255_v37, %v253_v35  ;;  %v259_v44 = vmul.f32 %v605_v2, %v258_v38  ;;  %s793_s4 = sld [smem:[#allocation2 + $0x35]]  ;;  %548 = vtanh.f32 %v205_v32 }
  0x4b   :  { %v262_v45 = vstv %s772_s25  ;;  %v266_v46 = vstv %s775_s26  ;;  %s798_s5 = sld [smem:[#allocation2 + $0x3c]] }
  0x4c   :  { %v238_v47 = vadd.f32 %v237_v29, %v234_v40  ;;  %v260_v48 = vadd.f32 %v259_v44, %v256_v42  ;;  %v263_v49 = vmul.f32 %v613_v5, %v262_v45  ;;  %v267_v50 = vmul.f32 %v626_v11, %v266_v46  ;;  %s802_s28 = sld [smem:[#allocation2 + $0x54]]  ;;  %v545_v5 = vpop.eup %544 }
  0x4d   :  { %v270_v2 = vstv %s778_s29  ;;  %v274_v51 = vstv %s782_s27  ;;  %s806_s6 = sld [smem:[#allocation2 + $0x3d]]  ;;  %v123_v1 = vmul.f32 0.5, %v545_v5 }
  0x4e   :  { %v242_v52 = vadd.f32 %v241_v41, %v238_v47  ;;  %v264_v53 = vadd.f32 %v263_v49, %v260_v48  ;;  %v271_v54 = vmul.f32 %v632_v16, %v270_v2  ;;  %s809_s7 = sld [smem:[#allocation2 + $0x3e]]  ;;  %v278_v56 = vstv %s786_s30  ;;  %v547_v4 = vpop.eup %546 }
  0x4f   :  { %s812_s0 = sld [smem:[#allocation2 + $0x3f]]  ;;  %v275_v58 = vmul.f32 %v640_v21, %v274_v51  ;;  %v282_v59 = vstv %s789_s3  ;;  %v279_v61 = vmul.f32 %v657_v36, %v278_v56  ;;  %v833_v9 = vadd.f32 0.5, %v123_v1 }
  0x50   :  { %v246_v11 = vadd.f32 %v245_v0, %v242_v52  ;;  %v268_v57 = vadd.f32 %v267_v50, %v264_v53  ;;  %s815_s8 = sld [smem:[#allocation2 + $0x40]]  ;;  %v286_v3 = vstv %s793_s4  ;;  %v283_v6 = vmul.f32 %v670_v43, %v282_v59 }
  0x51   :  { %s818_s9 = sld [smem:[#allocation2 + $0x41]]  ;;  %v294_v7 = vstv %s798_s5  ;;  %v287_v8 = vmul.f32 %v696_v62, %v286_v3  ;;  %v165_v10 = vmul.f32 0.5, %v547_v4 }
  0x52   :  { %v247_v60 = vmul.f32 0.5, %v246_v11  ;;  %v272_v16 = vadd.f32 %v271_v54, %v268_v57  ;;  %s515_s10 = sld [smem:[#allocation2 + $0x42]]  ;;  %v295_v12 = vmul.f32 %v294_v7, %v821_v63  ;;  %v297_v43 = vstv %s802_s28 }
  0x53   :  { %s824_s11 = sld [smem:[#allocation2 + $0x55]]  ;;  %v300_v15 = vstv %s806_s6  ;;  %v846_v22 = vadd.f32 0.5, %v165_v10 }
  0x54   :  { %550 = vtanh.f32 %v247_v60  ;;  %v276_v21 = vadd.f32 %v275_v58, %v272_v16  ;;  %s517_s12 = sld [smem:[#allocation2 + $0x43]]  ;;  %v298_v24 = vadd.f32 %v297_v43, %v295_v12  ;;  %v301_v25 = vmul.f32 %v300_v15, %v833_v9 }
  0x55   :  { %s828_s13 = sld [smem:[#allocation2 + $0x44]]  ;;  %v304_v27 = vstv %s809_s7  ;;  %v308_v31 = vstv %s812_s0 }
  0x56   :  { %v280_v36 = vadd.f32 %v279_v61, %v276_v21  ;;  %s831_s14 = sld [smem:[#allocation2 + $0x45]]  ;;  %v302_v33 = vadd.f32 %v301_v25, %v298_v24  ;;  %v305_v34 = vmul.f32 %v304_v27, %v846_v22  ;;  %v312_v55 = vstv %s815_s8 }
  0x57   :  { %s836_s15 = sld [smem:[#allocation2 + $0x46]]  ;;  %v549_v13 = vpop.eup %548 }
  0x58   :  { %v284_v14 = vadd.f32 %v283_v6, %v280_v36  ;;  %v324_v17 = vstv %s515_s10  ;;  %s840_s16 = sld [smem:[#allocation2 + $0x47]]  ;;  %v207_v23 = vmul.f32 0.5, %v549_v13  ;;  %v306_v48 = vadd.f32 %v305_v34, %v302_v33 }
  0x59   :  { %v325_v18 = vmul.f32 %v324_v17, %v821_v63  ;;  %v327_v62 = vstv %s824_s11  ;;  %s522_s17 = sld [smem:[#allocation2 + $0x48]]  ;;  %v316_v13 = vstv %s818_s9 }
  0x5a   :  { %v288_v19 = vadd.f32 %v287_v8, %v284_v14  ;;  %v330_v20 = vstv %s517_s12  ;;  %s844_s18 = sld [smem:[#allocation2 + $0x56]]  ;;  %v208_v32 = vadd.f32 0.5, %v207_v23 }
  0x5b   :  { %s524_s19 = sld [smem:[#allocation2 + $0x49]]  ;;  %v328_v28 = vadd.f32 %v327_v62, %v325_v18  ;;  %v331_v29 = vmul.f32 %v330_v20, %v833_v9  ;;  %v334_v30 = vstv %s828_s13 }
  0x5c   :  { %v289_v26 = vmul.f32 0.5, %v288_v19  ;;  %s525_s1 = sld [smem:[#allocation2 + $0x4a]]  ;;  %v335_v38 = vmul.f32 %v334_v30, %v846_v22  ;;  %v338_v42 = vstv %s831_s14  ;;  %v309_v49 = vmul.f32 %v308_v31, %v208_v32 }
  0x5d   :  { %s852_s20 = sld [smem:[#allocation2 + $0x4b]]  ;;  %v332_v37 = vadd.f32 %v331_v29, %v328_v28  ;;  %v339_v53 = vmul.f32 %v338_v42, %v208_v32  ;;  %v342_v56 = vstv %s836_s15 }
  0x5e   :  { %552 = vtanh.f32 %v289_v26  ;;  %s855_s21 = sld [smem:[#allocation2 + $0x4c]]  ;;  %v310_v58 = vadd.f32 %v309_v49, %v306_v48  ;;  %v346_v17 = vstv %s840_s16 }
  0x5f   :  { %v354_v35 = vstv %s522_s17  ;;  %s858_s22 = sld [smem:[#allocation2 + $0x4d]]  ;;  %v336_v52 = vadd.f32 %v335_v38, %v332_v37 }
  0x60   :  { %v355_v39 = vmul.f32 %v354_v35, %v821_v63  ;;  %v357_v40 = vstv %s844_s18  ;;  %s863_s23 = sld [smem:[#allocation2 + $0x4e]] }
  0x61   :  { %v551_v41 = vpop.eup %550  ;;  %v360_v44 = vstv %s524_s19  ;;  %s866_s24 = sld [smem:[#allocation2 + $0x57]]  ;;  %v340_v61 = vadd.f32 %v339_v53, %v336_v52 }
  0x62   :  { %v249_v0 = vmul.f32 0.5, %v551_v41  ;;  %v358_v45 = vadd.f32 %v357_v40, %v355_v39  ;;  %v361_v46 = vmul.f32 %v360_v44, %v833_v9  ;;  %v364_v47 = vstv %s525_s1  ;;  %s531_s25 = sld [smem:[#allocation2 + $0x4f]] }
  0x63   :  { %v365_v50 = vmul.f32 %v364_v47, %v846_v22  ;;  %v368_v2 = vstv %s852_s20  ;;  %s532_s26 = sld [smem:[#allocation2 + $0x50]] }
  0x64   :  { %v250_v51 = vadd.f32 0.5, %v249_v0  ;;  %v362_v54 = vadd.f32 %v361_v46, %v358_v45  ;;  %s533_s29 = sld [smem:[#allocation2 + $0x51]]  ;;  %v369_v5 = vmul.f32 %v368_v2, %v208_v32  ;;  %v372_v57 = vstv %s855_s21 }
  0x65   :  { %s873_s27 = sld [smem:[#allocation2 + $0x52]]  ;;  %v376_v23 = vstv %s858_s22 }
  0x66   :  { %v366_v11 = vadd.f32 %v365_v50, %v362_v54  ;;  %s876_s30 = sld [smem:[#allocation2 + $0x53]]  ;;  %v384_v59 = vstv %s863_s23  ;;  %v313_v16 = vmul.f32 %v312_v55, %v250_v51  ;;  %v343_v1 = vmul.f32 %v342_v56, %v250_v51 }
  0x67   :  { %v387_v60 = vstv %s866_s24  ;;  %v385_v3 = vmul.f32 %v384_v59, %v821_v63  ;;  %v373_v21 = vmul.f32 %v372_v57, %v250_v51  ;;  %s536_s3 = sld [smem:[#allocation2 + $0x58]] }
  0x68   :  { %v370_v4 = vadd.f32 %v369_v5, %v366_v11  ;;  %v390_v6 = vstv %s531_s25  ;;  %v314_v63 = vadd.f32 %v313_v16, %v310_v58  ;;  %v344_v19 = vadd.f32 %v343_v1, %v340_v61  ;;  %s537_s4 = sld [smem:[#allocation2 + $0x5c]] }
  0x69   :  { %v394_v7 = vstv %s532_s26  ;;  %v388_v36 = vadd.f32 %v387_v60, %v385_v3  ;;  %v391_v8 = vmul.f32 %v390_v6, %v833_v9  ;;  %s538_s5 = sld [smem:[#allocation2 + $0x59]] }
  0x6a   :  { %v395_v10 = vmul.f32 %v394_v7, %v846_v22  ;;  %v398_v14 = vstv %s533_s29  ;;  %v374_v20 = vadd.f32 %v373_v21, %v370_v4  ;;  %s539_s28 = sld [smem:[#allocation2 + $0x5a]] }
  0x6b   :  { %v553_v12 = vpop.eup %552  ;;  %v402_v43 = vstv %s873_s27  ;;  %v392_v18 = vadd.f32 %v391_v8, %v388_v36  ;;  %v399_v62 = vmul.f32 %v398_v14, %v208_v32  ;;  %s540_s6 = sld [smem:[#allocation2 + $0x5b]] }
  0x6c   :  { %v291_v15 = vmul.f32 0.5, %v553_v12  ;;  %v403_v26 = vmul.f32 %v402_v43, %v250_v51  ;;  %v406_v27 = vstv %s876_s30 }
  0x6d   :  { %v396_v25 = vadd.f32 %v395_v10, %v392_v18  ;;  %v414_v46 = vstv %s536_s3 }
  0x6e   :  { %v292_v24 = vadd.f32 0.5, %v291_v15  ;;  %v417_v52 = vstv %s537_s4 }
  0x6f   :  { %v400_v29 = vadd.f32 %v399_v62, %v396_v25  ;;  %v420_v50 = vstv %s538_s5 }
  0x70   :  { %v317_v9 = vmul.f32 %v316_v13, %v292_v24  ;;  %v347_v28 = vmul.f32 %v346_v17, %v292_v24  ;;  %v377_v22 = vmul.f32 %v376_v23, %v292_v24  ;;  %v407_v30 = vmul.f32 %v406_v27, %v292_v24 }
  0x71   :  { %v404_v35 = vadd.f32 %v403_v26, %v400_v29  ;;  %v424_v53 = vstv %s539_s28  ;;  %v428_v11 = vstv %s540_s6 }
  0x72   :  { %v318_v31 = vadd.f32 %v317_v9, %v314_v63  ;;  %v348_v33 = vadd.f32 %v347_v28, %v344_v19  ;;  %v378_v34 = vadd.f32 %v377_v22, %v374_v20 }
  0x73   :  { %v408_v39 = vadd.f32 %v407_v30, %v404_v35 }
  0x74   :  { %v319_v37 = vmul.f32 0.5, %v318_v31  ;;  %v349_v38 = vmul.f32 0.5, %v348_v33  ;;  %v379_v32 = vmul.f32 0.5, %v378_v34 }
  0x75   :  { %v409_v40 = vmul.f32 0.5, %v408_v39 }
  0x76   :  { %554 = vtanh.f32 %v319_v37 }
  0x77   :  { %556 = vtanh.f32 %v349_v38 }
  0x78   :  { %558 = vtanh.f32 %v379_v32 }
  0x79   :  { %560 = vtanh.f32 %v409_v40 }
  0x83   :  { %v555_v41 = vpop.eup %554 }
  0x84   :  { %v557_v42 = vpop.eup %556  ;;  %v321_v44 = vmul.f32 0.5, %v555_v41 }
  0x85   :  { %v559_v0 = vpop.eup %558  ;;  %v351_v45 = vmul.f32 0.5, %v557_v42 }
  0x86   :  { %v561_v47 = vpop.eup %560  ;;  %v322_v48 = vadd.f32 0.5, %v321_v44  ;;  %v381_v49 = vmul.f32 0.5, %v559_v0 }
  0x87   :  { %v352_v2 = vadd.f32 0.5, %v351_v45  ;;  %v411_v51 = vmul.f32 0.5, %v561_v47 }
  0x88   :  { %v382_v54 = vadd.f32 0.5, %v381_v49  ;;  %v415_v55 = vmul.f32 %v414_v46, %v322_v48 }
  0x89   :  { %v412_v56 = vadd.f32 0.5, %v411_v51  ;;  %v421_v5 = vmul.f32 %v420_v50, %v352_v2 }
  0x8a   :  { %v418_v57 = vadd.f32 %v417_v52, %v415_v55  ;;  %v425_v58 = vmul.f32 %v424_v53, %v382_v54 }
  0x8b   :  { %v429_v60 = vmul.f32 %v428_v11, %v412_v56 }
  0x8c   :  { %v422_v59 = vadd.f32 %v421_v5, %v418_v57 }
  0x8e   :  { %v426_v16 = vadd.f32 %v425_v58, %v422_v59 }
  0x90   :  { %v430_v61 = vadd.f32 %v429_v60, %v426_v16 }
  0x92   :  { %v431_v1 = vmul.f32 0.5, %v430_v61 }
  0x94   :  { %562 = vtanh.f32 %v431_v1 }
  0xa1   :  { %v563_v3 = vpop.eup %562 }
  0xa2   :  { %v433_v4 = vmul.f32 0.5, %v563_v3 }
  0xa4   :  { %v434_v21 = vadd.f32 0.5, %v433_v4 }
  0xa6   :  { %435 = vst [vmem:[%s893_s2] sm:$0xff] %v434_v21 }
  0xa7   :  { %440 = vsyncpa [#allocation3], 1 }

</bundles_post_ra>
